<compile_context>
chip_gen: v7x
topology: tpu7x:2x2x1
jax: 0.10.0
libtpu: 0.0.40
codegen_flags: <defaults>
</compile_context>

<pallas_src>
import functools

import jax
import jax.numpy as jnp
from jax import lax
from jax.experimental import pallas as pl
from jax.experimental.pallas import tpu as pltpu


def _resblock_kernel(x_ref, w_ref, b_ref, out_ref, pat_ref, *, NB, H, W, C, scale):
    f32 = jnp.float32
    cdt = pat_ref.dtype                      # bf16 compute dtype for MXU operands

    # ---- zero only the halo of the dx-shift patch (once per grid step) ------
    # Interior is fully rewritten by fill_patch() for each conv; the halo
    # (top/bottom padded rows + the out-of-image column of the dx=0 / dx=2
    # shifted copies) is never written again, so zeroing it once suffices.
    # Done every step, so it stays correct under megacore-parallel sharding.
    z_row = jnp.zeros((NB, 1, W, 3 * C), cdt)
    pat_ref[:, 0:1, :, :] = z_row
    pat_ref[:, H + 1:H + 2, :, :] = z_row
    z_col = jnp.zeros((NB, H, 1, C), cdt)
    pat_ref[:, 1:H + 1, 0:1, 0:C] = z_col                 # dx=0: left pad column
    pat_ref[:, 1:H + 1, W - 1:W, 2 * C:3 * C] = z_col     # dx=2: right pad column

    def fill_patch(v):
        # v: (NB, H, W, C) bf16.  Write the 3 width-shifted copies into lane
        # offsets 0 / C / 2C — only 3 masked stores per conv (was 9 tap writes).
        pat_ref[:, 1:H + 1, 1:W, 0:C] = v[:, :, 0:W - 1, :]
        pat_ref[:, 1:H + 1, :, C:2 * C] = v
        pat_ref[:, 1:H + 1, 0:W - 1, 2 * C:3 * C] = v[:, :, 1:W, :]

    def conv3x3(v):
        # 3x3 "same" conv: build the dx-shift patch once, then 3 accumulated
        # K=3*C bf16 MXU matmuls; the dy shift is a free leading-dim slice.
        fill_patch(v)
        acc = jnp.zeros((NB * H * W, C), f32)
        for dy in range(3):
            p = pat_ref[:, dy:dy + H, :, :].reshape(NB * H * W, 3 * C)
            wk = w_ref[dy * 3 * C:(dy + 1) * 3 * C, :]
            acc = acc + jnp.dot(p, wk, preferred_element_type=f32)
        return acc + b_ref[...]                           # f32 bias, broadcasts (1, C)

    # Single load of x: conv1 input (cast to bf16) AND the f32 residual.
    x = x_ref[...]                                        # (NB, H, W, C) f32
    t1 = jnp.maximum(conv3x3(x.astype(cdt)), 0.0)         # conv1 + ReLU   (f32)
    t2 = conv3x3(t1.astype(cdt).reshape(NB, H, W, C))     # conv2, same weights
    out = x.reshape(NB * H * W, C) + jnp.float32(scale) * t2
    out_ref[...] = out.reshape(NB, H, W, C)


def _grid_steps_for_device(N):
    """Single-TC chips (v5e/v6e): 1 step (amortize per-step overhead).
    Dual-TC chips (v7x and unknown/other): 2 parallel steps for the megacore."""
    try:
        kind = jax.devices()[0].device_kind.lower()
    except Exception:
        kind = ""
    if ("v5" in kind) or ("v6" in kind):
        steps = 1
    else:
        steps = min(2, N)
    if steps < 1 or N % steps != 0:
        steps = 1
    return steps


def resblock_pallas(x_nchw, weight_oihw, bias, scale=0.1, grid_steps=None):
    """x_nchw: (N, C, H, W) f32. weight_oihw: (C, C, 3, 3). bias: (C,)."""
    N, C, H, W = x_nchw.shape
    if grid_steps is None:
        grid_steps = _grid_steps_for_device(N)
    assert N % grid_steps == 0
    NB = N // grid_steps

    x_nhwc = jnp.transpose(x_nchw, (0, 2, 3, 1)).astype(jnp.float32)

    # (O, I, kh, kw) -> (kh, kw, I, O) -> (9*C_in, C_out); row = (dy*3+dx)*C + c_in,
    # matching the dx-major lane order of the in-kernel dx-shift patch.
    w = jnp.transpose(weight_oihw, (2, 3, 1, 0)).reshape(9 * C, C).astype(jnp.bfloat16)
    b = bias.reshape(1, C).astype(jnp.float32)

    kernel = functools.partial(_resblock_kernel, NB=NB, H=H, W=W, C=C,
                               scale=float(scale))

    out_nhwc = pl.pallas_call(
        kernel,
        out_shape=jax.ShapeDtypeStruct((N, H, W, C), jnp.float32),
        grid_spec=pltpu.PrefetchScalarGridSpec(
            num_scalar_prefetch=0,
            grid=(grid_steps,),                                   # NB images / step
            in_specs=[
                pl.BlockSpec((NB, H, W, C), lambda n: (n, 0, 0, 0)),  # x (conv in + residual)
                pl.BlockSpec((9 * C, C), lambda n: (0, 0)),           # shared conv weights (bf16)
                pl.BlockSpec((1, C), lambda n: (0, 0)),               # conv bias (f32)
            ],
            out_specs=pl.BlockSpec((NB, H, W, C), lambda n: (n, 0, 0, 0)),
            scratch_shapes=[
                pltpu.VMEM((NB, H + 2, W, 3 * C), jnp.bfloat16),      # dx-shift im2col patch
            ],
        ),
        compiler_params=pltpu.CompilerParams(
            dimension_semantics=("parallel",),   # batch axis shardable across TCs (v7x)
            vmem_limit_bytes=32 * 1024 * 1024,
        ),
    )(x_nhwc, w, b)

    return jnp.transpose(out_nhwc, (0, 3, 1, 2))


def resblock_reference(x_nchw, weight_oihw, bias, scale=0.1):
    def conv(z):
        y = lax.conv_general_dilated(
            z, weight_oihw, window_strides=(1, 1), padding=((1, 1), (1, 1)),
            dimension_numbers=("NCHW", "OIHW", "NCHW"))
        return y + bias[None, :, None, None]
    t = jax.nn.relu(conv(x_nchw))
    t = conv(t)
    return x_nchw + scale * t


if __name__ == "__main__":
    # Small, module-consistent shapes: batch=2, feature_size=32, spatial=16x16.
    N, C, H, W = 2, 32, 16, 16
    key = jax.random.PRNGKey(0)
    kx, kw, kb = jax.random.split(key, 3)

    # Deterministic synthetic parameters (PyTorch-like uniform fan-in scaling).
    fan_in = C * 3 * 3
    bound = 1.0 / (fan_in ** 0.5)
    x = jax.random.normal(kx, (N, C, H, W), dtype=jnp.float32)
    weight = jax.random.uniform(kw, (C, C, 3, 3), minval=-bound, maxval=bound,
                                dtype=jnp.float32)
    bias = jax.random.uniform(kb, (C,), minval=-bound, maxval=bound,
                              dtype=jnp.float32)

    out = resblock_pallas(x, weight, bias, scale=0.1)
    out = jax.block_until_ready(out)

    ref = resblock_reference(x, weight, bias, scale=0.1)
    assert out.shape == (N, C, H, W)
    max_err = jnp.max(jnp.abs(out - ref))
    # bf16 MXU operands (f32 accumulation) -> loosened tolerance vs f32 reference.
    assert jnp.allclose(out, ref, atol=1e-2, rtol=1e-2), (
        f"mismatch vs reference (max abs err {max_err})")

    print("KERNEL_OK")
</pallas_src>

<mosaic_0001>
module attributes {stable_mosaic.version = 11 : i64} {
  func.func @_resblock_kernel(%arg0: i32, %arg1: memref<1x16x16x32xf32, #tpu.memory_space<vmem>>, %arg2: memref<288x32xbf16, #tpu.memory_space<vmem>>, %arg3: memref<1x32xf32, #tpu.memory_space<vmem>>, %arg4: memref<1x16x16x32xf32, #tpu.memory_space<vmem>>, %arg5: memref<1x18x16x96xbf16, #tpu.memory_space<vmem>>) attributes {dimension_semantics = [#tpu.dimension_semantics<parallel>], iteration_bounds = array<i64: 2>, scalar_prefetch = 0 : i64, scratch_operands = 1 : i64, tpu.core_type = #tpu.core_type<tc>, window_params = [{transform_indices = @transform_0, window_bounds = array<i64: 1, 16, 16, 32>}, {pipeline_mode = #tpu.pipeline_mode<synchronous>, transform_indices = @transform_1, window_bounds = array<i64: 288, 32>}, {pipeline_mode = #tpu.pipeline_mode<synchronous>, transform_indices = @transform_2, window_bounds = array<i64: 1, 32>}, {transform_indices = @transform_3, window_bounds = array<i64: 1, 16, 16, 32>}]} {
    %cst = arith.constant 0.000000e+00 : bf16
    %0 = vector.broadcast %cst : bf16 to vector<1x1x16x96xbf16>
    %c0 = arith.constant 0 : index
    %c0_0 = arith.constant 0 : index
    %c0_1 = arith.constant 0 : index
    %c0_2 = arith.constant 0 : index
    %1 = vector.load %arg5[%c0, %c0_0, %c0_1, %c0_2] : memref<1x18x16x96xbf16, #tpu.memory_space<vmem>>, vector<1x1x16x96xbf16>
    tpu.vector_store %arg5[%c0, %c0_0, %c0_1, %c0_2], %0 {strides = array<i32>} : memref<1x18x16x96xbf16, #tpu.memory_space<vmem>>, vector<1x1x16x96xbf16>,
    %c0_3 = arith.constant 0 : index
    %c17 = arith.constant 17 : index
    %c0_4 = arith.constant 0 : index
    %c0_5 = arith.constant 0 : index
    %2 = vector.load %arg5[%c0_3, %c17, %c0_4, %c0_5] : memref<1x18x16x96xbf16, #tpu.memory_space<vmem>>, vector<1x1x16x96xbf16>
    tpu.vector_store %arg5[%c0_3, %c17, %c0_4, %c0_5], %0 {strides = array<i32>} : memref<1x18x16x96xbf16, #tpu.memory_space<vmem>>, vector<1x1x16x96xbf16>,
    %cst_6 = arith.constant 0.000000e+00 : bf16
    %3 = vector.broadcast %cst_6 : bf16 to vector<1x16x1x32xbf16>
    %c0_7 = arith.constant 0 : index
    %c1 = arith.constant 1 : index
    %c0_8 = arith.constant 0 : index
    %c0_9 = arith.constant 0 : index
    %4 = vector.load %arg5[%c0_7, %c1, %c0_8, %c0_9] : memref<1x18x16x96xbf16, #tpu.memory_space<vmem>>, vector<1x16x1x32xbf16>
    tpu.vector_store %arg5[%c0_7, %c1, %c0_8, %c0_9], %3 {strides = array<i32>} : memref<1x18x16x96xbf16, #tpu.memory_space<vmem>>, vector<1x16x1x32xbf16>,
    %c0_10 = arith.constant 0 : index
    %c1_11 = arith.constant 1 : index
    %c15 = arith.constant 15 : index
    %c64 = arith.constant 64 : index
    %5 = vector.load %arg5[%c0_10, %c1_11, %c15, %c64] : memref<1x18x16x96xbf16, #tpu.memory_space<vmem>>, vector<1x16x1x32xbf16>
    tpu.vector_store %arg5[%c0_10, %c1_11, %c15, %c64], %3 {strides = array<i32>} : memref<1x18x16x96xbf16, #tpu.memory_space<vmem>>, vector<1x16x1x32xbf16>,
    %c0_12 = arith.constant 0 : index
    %c0_13 = arith.constant 0 : index
    %c0_14 = arith.constant 0 : index
    %c0_15 = arith.constant 0 : index
    %6 = vector.load %arg1[%c0_12, %c0_13, %c0_14, %c0_15] : memref<1x16x16x32xf32, #tpu.memory_space<vmem>>, vector<1x16x16x32xf32>
    %7 = arith.truncf %6 : vector<1x16x16x32xf32> to vector<1x16x16x32xbf16>
    %8 = vector.extract_strided_slice %7 {offsets = [0, 0, 0, 0], sizes = [1, 16, 15, 32], strides = [1, 1, 1, 1]} : vector<1x16x16x32xbf16> to vector<1x16x15x32xbf16>
    %c0_16 = arith.constant 0 : index
    %c1_17 = arith.constant 1 : index
    %c1_18 = arith.constant 1 : index
    %c0_19 = arith.constant 0 : index
    %9 = vector.load %arg5[%c0_16, %c1_17, %c1_18, %c0_19] : memref<1x18x16x96xbf16, #tpu.memory_space<vmem>>, vector<1x16x15x32xbf16>
    tpu.vector_store %arg5[%c0_16, %c1_17, %c1_18, %c0_19], %8 {strides = array<i32>} : memref<1x18x16x96xbf16, #tpu.memory_space<vmem>>, vector<1x16x15x32xbf16>,
    %c0_20 = arith.constant 0 : index
    %c1_21 = arith.constant 1 : index
    %c0_22 = arith.constant 0 : index
    %c32 = arith.constant 32 : index
    %10 = vector.load %arg5[%c0_20, %c1_21, %c0_22, %c32] : memref<1x18x16x96xbf16, #tpu.memory_space<vmem>>, vector<1x16x16x32xbf16>
    tpu.vector_store %arg5[%c0_20, %c1_21, %c0_22, %c32], %7 {strides = array<i32>} : memref<1x18x16x96xbf16, #tpu.memory_space<vmem>>, vector<1x16x16x32xbf16>,
    %11 = vector.extract_strided_slice %7 {offsets = [0, 0, 1, 0], sizes = [1, 16, 15, 32], strides = [1, 1, 1, 1]} : vector<1x16x16x32xbf16> to vector<1x16x15x32xbf16>
    %c0_23 = arith.constant 0 : index
    %c1_24 = arith.constant 1 : index
    %c0_25 = arith.constant 0 : index
    %c64_26 = arith.constant 64 : index
    %12 = vector.load %arg5[%c0_23, %c1_24, %c0_25, %c64_26] : memref<1x18x16x96xbf16, #tpu.memory_space<vmem>>, vector<1x16x15x32xbf16>
    tpu.vector_store %arg5[%c0_23, %c1_24, %c0_25, %c64_26], %11 {strides = array<i32>} : memref<1x18x16x96xbf16, #tpu.memory_space<vmem>>, vector<1x16x15x32xbf16>,
    %cst_27 = arith.constant 0.000000e+00 : f32
    %13 = vector.broadcast %cst_27 : f32 to vector<256x32xf32>
    %c0_28 = arith.constant 0 : index
    %c0_29 = arith.constant 0 : index
    %c0_30 = arith.constant 0 : index
    %c0_31 = arith.constant 0 : index
    %14 = vector.load %arg5[%c0_28, %c0_29, %c0_30, %c0_31] : memref<1x18x16x96xbf16, #tpu.memory_space<vmem>>, vector<1x16x16x96xbf16>
    %15 = vector.shape_cast %14 : vector<1x16x16x96xbf16> to vector<256x96xbf16>
    %c0_32 = arith.constant 0 : index
    %c0_33 = arith.constant 0 : index
    %16 = vector.load %arg2[%c0_32, %c0_33] : memref<288x32xbf16, #tpu.memory_space<vmem>>, vector<96x32xbf16>
    %cst_34 = arith.constant dense<0.000000e+00> : vector<256x32xf32>
    %17 = tpu.matmul %15, %16, %cst_34 {dimension_numbers = #tpu.dot_dimension_numbers<[1], [0], [0], [1], [0, 0, 1, 1], [], []>} : vector<256x96xbf16>, vector<96x32xbf16>, vector<256x32xf32> -> vector<256x32xf32>
    %18 = arith.addf %13, %17 : vector<256x32xf32>
    %c0_35 = arith.constant 0 : index
    %c1_36 = arith.constant 1 : index
    %c0_37 = arith.constant 0 : index
    %c0_38 = arith.constant 0 : index
    %19 = vector.load %arg5[%c0_35, %c1_36, %c0_37, %c0_38] : memref<1x18x16x96xbf16, #tpu.memory_space<vmem>>, vector<1x16x16x96xbf16>
    %20 = vector.shape_cast %19 : vector<1x16x16x96xbf16> to vector<256x96xbf16>
    %c96 = arith.constant 96 : index
    %c0_39 = arith.constant 0 : index
    %21 = vector.load %arg2[%c96, %c0_39] : memref<288x32xbf16, #tpu.memory_space<vmem>>, vector<96x32xbf16>
    %cst_40 = arith.constant dense<0.000000e+00> : vector<256x32xf32>
    %22 = tpu.matmul %20, %21, %cst_40 {dimension_numbers = #tpu.dot_dimension_numbers<[1], [0], [0], [1], [0, 0, 1, 1], [], []>} : vector<256x96xbf16>, vector<96x32xbf16>, vector<256x32xf32> -> vector<256x32xf32>
    %23 = arith.addf %18, %22 : vector<256x32xf32>
    %c0_41 = arith.constant 0 : index
    %c2 = arith.constant 2 : index
    %c0_42 = arith.constant 0 : index
    %c0_43 = arith.constant 0 : index
    %24 = vector.load %arg5[%c0_41, %c2, %c0_42, %c0_43] : memref<1x18x16x96xbf16, #tpu.memory_space<vmem>>, vector<1x16x16x96xbf16>
    %25 = vector.shape_cast %24 : vector<1x16x16x96xbf16> to vector<256x96xbf16>
    %c192 = arith.constant 192 : index
    %c0_44 = arith.constant 0 : index
    %26 = vector.load %arg2[%c192, %c0_44] : memref<288x32xbf16, #tpu.memory_space<vmem>>, vector<96x32xbf16>
    %cst_45 = arith.constant dense<0.000000e+00> : vector<256x32xf32>
    %27 = tpu.matmul %25, %26, %cst_45 {dimension_numbers = #tpu.dot_dimension_numbers<[1], [0], [0], [1], [0, 0, 1, 1], [], []>} : vector<256x96xbf16>, vector<96x32xbf16>, vector<256x32xf32> -> vector<256x32xf32>
    %28 = arith.addf %23, %27 : vector<256x32xf32>
    %c0_46 = arith.constant 0 : index
    %c0_47 = arith.constant 0 : index
    %29 = vector.load %arg3[%c0_46, %c0_47] : memref<1x32xf32, #tpu.memory_space<vmem>>, vector<1x32xf32>
    %30 = vector.broadcast %29 : vector<1x32xf32> to vector<256x32xf32>
    %31 = arith.addf %28, %30 : vector<256x32xf32>
    %cst_48 = arith.constant 0.000000e+00 : f32
    %32 = vector.broadcast %cst_48 : f32 to vector<256x32xf32>
    %33 = arith.maximumf %31, %32 : vector<256x32xf32>
    %34 = arith.truncf %33 : vector<256x32xf32> to vector<256x32xbf16>
    %35 = vector.shape_cast %34 : vector<256x32xbf16> to vector<1x16x16x32xbf16>
    %36 = vector.extract_strided_slice %35 {offsets = [0, 0, 0, 0], sizes = [1, 16, 15, 32], strides = [1, 1, 1, 1]} : vector<1x16x16x32xbf16> to vector<1x16x15x32xbf16>
    %c0_49 = arith.constant 0 : index
    %c1_50 = arith.constant 1 : index
    %c1_51 = arith.constant 1 : index
    %c0_52 = arith.constant 0 : index
    %37 = vector.load %arg5[%c0_49, %c1_50, %c1_51, %c0_52] : memref<1x18x16x96xbf16, #tpu.memory_space<vmem>>, vector<1x16x15x32xbf16>
    tpu.vector_store %arg5[%c0_49, %c1_50, %c1_51, %c0_52], %36 {strides = array<i32>} : memref<1x18x16x96xbf16, #tpu.memory_space<vmem>>, vector<1x16x15x32xbf16>,
    %c0_53 = arith.constant 0 : index
    %c1_54 = arith.constant 1 : index
    %c0_55 = arith.constant 0 : index
    %c32_56 = arith.constant 32 : index
    %38 = vector.load %arg5[%c0_53, %c1_54, %c0_55, %c32_56] : memref<1x18x16x96xbf16, #tpu.memory_space<vmem>>, vector<1x16x16x32xbf16>
    tpu.vector_store %arg5[%c0_53, %c1_54, %c0_55, %c32_56], %35 {strides = array<i32>} : memref<1x18x16x96xbf16, #tpu.memory_space<vmem>>, vector<1x16x16x32xbf16>,
    %39 = vector.extract_strided_slice %35 {offsets = [0, 0, 1, 0], sizes = [1, 16, 15, 32], strides = [1, 1, 1, 1]} : vector<1x16x16x32xbf16> to vector<1x16x15x32xbf16>
    %c0_57 = arith.constant 0 : index
    %c1_58 = arith.constant 1 : index
    %c0_59 = arith.constant 0 : index
    %c64_60 = arith.constant 64 : index
    %40 = vector.load %arg5[%c0_57, %c1_58, %c0_59, %c64_60] : memref<1x18x16x96xbf16, #tpu.memory_space<vmem>>, vector<1x16x15x32xbf16>
    tpu.vector_store %arg5[%c0_57, %c1_58, %c0_59, %c64_60], %39 {strides = array<i32>} : memref<1x18x16x96xbf16, #tpu.memory_space<vmem>>, vector<1x16x15x32xbf16>,
    %cst_61 = arith.constant 0.000000e+00 : f32
    %41 = vector.broadcast %cst_61 : f32 to vector<256x32xf32>
    %c0_62 = arith.constant 0 : index
    %c0_63 = arith.constant 0 : index
    %c0_64 = arith.constant 0 : index
    %c0_65 = arith.constant 0 : index
    %42 = vector.load %arg5[%c0_62, %c0_63, %c0_64, %c0_65] : memref<1x18x16x96xbf16, #tpu.memory_space<vmem>>, vector<1x16x16x96xbf16>
    %43 = vector.shape_cast %42 : vector<1x16x16x96xbf16> to vector<256x96xbf16>
    %c0_66 = arith.constant 0 : index
    %c0_67 = arith.constant 0 : index
    %44 = vector.load %arg2[%c0_66, %c0_67] : memref<288x32xbf16, #tpu.memory_space<vmem>>, vector<96x32xbf16>
    %cst_68 = arith.constant dense<0.000000e+00> : vector<256x32xf32>
    %45 = tpu.matmul %43, %44, %cst_68 {dimension_numbers = #tpu.dot_dimension_numbers<[1], [0], [0], [1], [0, 0, 1, 1], [], []>} : vector<256x96xbf16>, vector<96x32xbf16>, vector<256x32xf32> -> vector<256x32xf32>
    %46 = arith.addf %41, %45 : vector<256x32xf32>
    %c0_69 = arith.constant 0 : index
    %c1_70 = arith.constant 1 : index
    %c0_71 = arith.constant 0 : index
    %c0_72 = arith.constant 0 : index
    %47 = vector.load %arg5[%c0_69, %c1_70, %c0_71, %c0_72] : memref<1x18x16x96xbf16, #tpu.memory_space<vmem>>, vector<1x16x16x96xbf16>
    %48 = vector.shape_cast %47 : vector<1x16x16x96xbf16> to vector<256x96xbf16>
    %c96_73 = arith.constant 96 : index
    %c0_74 = arith.constant 0 : index
    %49 = vector.load %arg2[%c96_73, %c0_74] : memref<288x32xbf16, #tpu.memory_space<vmem>>, vector<96x32xbf16>
    %cst_75 = arith.constant dense<0.000000e+00> : vector<256x32xf32>
    %50 = tpu.matmul %48, %49, %cst_75 {dimension_numbers = #tpu.dot_dimension_numbers<[1], [0], [0], [1], [0, 0, 1, 1], [], []>} : vector<256x96xbf16>, vector<96x32xbf16>, vector<256x32xf32> -> vector<256x32xf32>
    %51 = arith.addf %46, %50 : vector<256x32xf32>
    %c0_76 = arith.constant 0 : index
    %c2_77 = arith.constant 2 : index
    %c0_78 = arith.constant 0 : index
    %c0_79 = arith.constant 0 : index
    %52 = vector.load %arg5[%c0_76, %c2_77, %c0_78, %c0_79] : memref<1x18x16x96xbf16, #tpu.memory_space<vmem>>, vector<1x16x16x96xbf16>
    %53 = vector.shape_cast %52 : vector<1x16x16x96xbf16> to vector<256x96xbf16>
    %c192_80 = arith.constant 192 : index
    %c0_81 = arith.constant 0 : index
    %54 = vector.load %arg2[%c192_80, %c0_81] : memref<288x32xbf16, #tpu.memory_space<vmem>>, vector<96x32xbf16>
    %cst_82 = arith.constant dense<0.000000e+00> : vector<256x32xf32>
    %55 = tpu.matmul %53, %54, %cst_82 {dimension_numbers = #tpu.dot_dimension_numbers<[1], [0], [0], [1], [0, 0, 1, 1], [], []>} : vector<256x96xbf16>, vector<96x32xbf16>, vector<256x32xf32> -> vector<256x32xf32>
    %56 = arith.addf %51, %55 : vector<256x32xf32>
    %c0_83 = arith.constant 0 : index
    %c0_84 = arith.constant 0 : index
    %57 = vector.load %arg3[%c0_83, %c0_84] : memref<1x32xf32, #tpu.memory_space<vmem>>, vector<1x32xf32>
    %58 = vector.broadcast %57 : vector<1x32xf32> to vector<256x32xf32>
    %59 = arith.addf %56, %58 : vector<256x32xf32>
    %60 = vector.shape_cast %6 : vector<1x16x16x32xf32> to vector<256x32xf32>
    %cst_85 = arith.constant 1.000000e-01 : f32
    %61 = vector.broadcast %cst_85 : f32 to vector<256x32xf32>
    %62 = arith.mulf %61, %59 : vector<256x32xf32>
    %63 = arith.addf %60, %62 : vector<256x32xf32>
    %64 = vector.shape_cast %63 : vector<256x32xf32> to vector<1x16x16x32xf32>
    %c0_86 = arith.constant 0 : index
    %c0_87 = arith.constant 0 : index
    %c0_88 = arith.constant 0 : index
    %c0_89 = arith.constant 0 : index
    %65 = vector.load %arg4[%c0_86, %c0_87, %c0_88, %c0_89] : memref<1x16x16x32xf32, #tpu.memory_space<vmem>>, vector<1x16x16x32xf32>
    tpu.vector_store %arg4[%c0_86, %c0_87, %c0_88, %c0_89], %64 {strides = array<i32>} : memref<1x16x16x32xf32, #tpu.memory_space<vmem>>, vector<1x16x16x32xf32>,
    return
  }
  func.func @transform_0(%arg0: i32) -> (i32, i32, i32, i32) {
    %c0_i32 = arith.constant 0 : i32
    %c0_i32_0 = arith.constant 0 : i32
    %c0_i32_1 = arith.constant 0 : i32
    %c0_i32_2 = arith.constant 0 : i32
    return %arg0, %c0_i32, %c0_i32_0, %c0_i32_1 : i32, i32, i32, i32
  }
  func.func @transform_1(%arg0: i32) -> (i32, i32) {
    %c0_i32 = arith.constant 0 : i32
    %c0_i32_0 = arith.constant 0 : i32
    %c0_i32_1 = arith.constant 0 : i32
    return %c0_i32, %c0_i32_0 : i32, i32
  }
  func.func @transform_2(%arg0: i32) -> (i32, i32) {
    %c0_i32 = arith.constant 0 : i32
    %c0_i32_0 = arith.constant 0 : i32
    %c0_i32_1 = arith.constant 0 : i32
    return %c0_i32, %c0_i32_0 : i32, i32
  }
  func.func @transform_3(%arg0: i32) -> (i32, i32, i32, i32) {
    %c0_i32 = arith.constant 0 : i32
    %c0_i32_0 = arith.constant 0 : i32
    %c0_i32_1 = arith.constant 0 : i32
    %c0_i32_2 = arith.constant 0 : i32
    return %arg0, %c0_i32, %c0_i32_0, %c0_i32_1 : i32, i32, i32, i32
  }
}

</mosaic_0001>

<bundles_post_ra>
// kernel: tpu_custom_call.1
= control target key start
LH: loop header
LB: loop body
LE: loop exit
PB: predicated region body
PF: predicated region fallthrough
CT: control target
= control target key end

     0   :  { %8 = vsyncpa [#allocation4], 0  ;;  %s5238_s0 = inlined_call_operand.hbm [shape: f32[2,16,16,32], index: 0, kind: input, shape index: {}]   ;;  %s5239_s1 = inlined_call_operand.vmem [shape: bf16[288,32], index: 1, kind: input, shape index: {}]   ;;  %s5240_s2 = inlined_call_operand.vmem [shape: f32[1,32], index: 2, kind: input, shape index: {}]   ;;  %s5241_s3 = inlined_call_operand.hbm [shape: f32[2,16,16,32], index: 3, kind: output, shape index: {}]  }
   0x1   :  { %10 = vsyncpa [#allocation4 + $0x1], 0 }
   0x2   :  { %11 = vsyncpa [#allocation5], 0 }
   0x3   :  { %13 = vsyncpa [#allocation5 + $0x1], 0  ;;  %s4054_s12 = smov 0   ;;  %s4056_s13 = smov 0  }
   0x4   :  { %s4058_s14 = smov 0   ;;  %s4060_s15 = smov 0  }
   0x5 LB: > { %s4075_s16 = sadd.s32 4294967295, %s4023_s15   ;;  %s3132_s17 = sadd.s32 4294967294, %s4023_s15   ;;  %s4023_s15 = sphi %s4060_s15, %s5262_s15   ;;  %s4019_s14 = sphi %s4058_s14, %s5261_s14   ;;  %s4015_s13 = sphi %s4056_s13, %s5260_s13   ;;  %s4011_s12 = sphi %s4054_s12, %s5259_s12  }
   0x6   : > { %s4079_s18 = sadd.s32 1, %s4023_s15   ;;  %s26_s19 = sadd.s32 1, %s4019_s14 }
   0x7   : > { %s23_s20 = ssub.s32 %s4023_s15, %s4079_s18  ;;  %p33_p0 = scmp.ne.s32.totalorder %s4019_s14, %s4015_s13 }
   0x8   : > { %p24_p1 = scmp.eq.s32.totalorder %s23_s20, 0  ;;  %p34_p2 = scmp.eq.s32.totalorder %s4023_s15, 0 }
   0x9   : > { %p39_p3 = scmp.ne.s32.totalorder %s4015_s13, %s4011_s12  ;;  %p40_p4 = scmp.eq.s32.totalorder %s4075_s16, 0 }
   0xa   : > { %s4091_s21 = scalar_select %p24_p1, %s4019_s14, %s26_s19  }
   0xb   : > { %p4093_p5 = por %p34_p2, %p33_p0  ;;  %p4097_p6 = por %p40_p4, %p39_p3 }
   0xc   : > { %p105_p7 = scmp.eq.s32.totalorder %s4075_s16, 1  ;;  %p111_p8 = scmp.eq.s32.totalorder %s3132_s17, 1 }
   0xd   : > { %p3818_p10 = scmp.lt.s32.totalorder %s4023_s15, 2  ;;  %s137_s26 = sand.u32 1, %s4019_s14  }
   0xe   : > { %p4104_p11 = por %p105_p7, %p33_p0  ;;  %p4108_p12 = por %p111_p8, %p39_p3 }
   0xf   : > { %s3280_s27 = sshll.u32 %s4023_s15, 12  ;;  %s3135_s28 = sshll.u32 %s137_s26, 8 }
  0x10   : > { %s5245_s24 = scalar_select %p4104_p11, 1, 0 }
  0x11   : > { %s5246_s25 = scalar_select %p4108_p12, 1, 0 }
  0x12   : > { %s4117_s4 = scalar_lea.hbm %s5238_s0, %s3280_s27  ;;  %s141_s5 = scalar_lea.vmem [#allocation3], %s3135_s28 }
  0x13   : > { %s148_s6 = sshll.u32 %s141_s5, 4  ;;  %p4121_p13 = pnand %p3818_p10, %p4093_p5  ;;  %s4125_s6 = int_to_ptr.vmem [resolvable:$true] %s148_s6 }
  0x14   : > { %s4127_s8 = scalar_lea.sflag [#allocation4], %s137_s26  ;;  %s3927_s9 = scalar_lea.hbm %s4117_s4, 4096 }
  0x15   : > { %p3928_p0 = scmp.ne.s32.totalorder %s4117_s4, %s3927_s9  ;;  %p3929_p1 = pneg %p4121_p13 }
  0x16   : > { %s3932_s17 = scalar_lea.hbm %s5238_s0, 8192  ;;  %p3933_p4 = scmp.lt.u32.totalorder %s4117_s4, %s5238_s0 }
  0x17   : > { %p3930_p2 = pnand %p3929_p1, %p3928_p0  ;;  %p3934_p5 = scmp.lt.u32.totalorder %s3932_s17, %s3927_s9 }
  0x18   : > { %p3936_p8 = scmp.lt.u32.totalorder %s3927_s9, %s4117_s4 }
  0x19   : > { %p3931_p3 = pneg %p3930_p2  ;;  %p3935_p7 = por %p3934_p5, %p3933_p4 }
  0x1b   : > { %p3937_p10 = por %p3936_p8, %p3935_p7 }
  0x1d   : > { %p3938_p9 = pnand %p3937_p10, %p3931_p3 }
  0x1f   : > { %3941 = shalt.err (!%p3938_p9)
}
  0x20   : > { %s3942_s22 = scalar_lea.vmem %s4125_s6, 4096  ;;  %s4025_s26 = smov [#allocation3]  }
  0x21   : > { %p3943_p0 = scmp.ne.s32.totalorder %s4125_s6, %s3942_s22  ;;  %s3947_s27 = sshll.u32 %s4025_s26, 4  ;;  %s3948_s27 = int_to_ptr.vmem [resolvable:$false] %s3947_s27 }
  0x22   : > { %s3949_s28 = scalar_lea.vmem %s3948_s27, 8192  ;;  %p3950_p11 = scmp.lt.s32.totalorder %s4125_s6, %s3948_s27 }
  0x23   : > { %p3945_p2 = pnand %p3943_p0, %p3929_p1  ;;  %p3951_p4 = scmp.lt.s32.totalorder %s3949_s28, %s3942_s22 }
  0x25   : > { %p3946_p12 = pneg %p3945_p2  ;;  %p3952_p5 = por %p3951_p4, %p3950_p11 }
  0x27   : > { %p3953_p7 = pnand %p3952_p5, %p3946_p12 }
  0x29   : > { %3956 = shalt.err (!%p3953_p7)
}
  0x2a   : > { %s4026_s29 = smov 128   ;;  %s4027_s30 = smov 8  }
  0x2b   : > { %3813 = dma.hbm_to_vmem [thread:$0]  (!%p4121_p13), %s4117_s4, 4096, %s4125_s6, %s4127_s8, %s4026_s29, %s4026_s29, %s4027_s30  }
  0x2c   : > { %p3138_p9 = scmp.ge.s32.totalorder %s4023_s15, 1  ;;  %p156_p1 = scmp.lt.s32.totalorder %s4023_s15, 3 }
  0x2e   : > { %p157_p3 = pnand %p3138_p9, %p156_p1 }
  0x2f   : > { %s4158_s5 = sand.u32 (!%p157_p3), 1, %s4015_s13  }
  0x30   : > { %160 = sbr.rel (%p157_p3) target bundleno = 1085 (0x43d), region = 32  ;;  %s3139_s9 = sshll.u32 (!%p157_p3), %s4158_s5, 8 }
  0x31   : > { %s163_s10 = scalar_lea.sflag (!%p157_p3), [#allocation4], %s4158_s5  ;;  %s4164_s11 = scalar_lea.vmem (!%p157_p3), [#allocation3], %s3139_s9 }
  0x37   : > { %4002 = dma.done.wait (%p4097_p6), %s163_s10, 4096  }
  0x38   : > { %4004 = vsyncadd (%p4097_p6), %s163_s10, 4294963200  ;;  %vm195_vm0 = vcmask 253952   ;;  %vm196_vm1 = vsmask.f32 256  ;;  %vm246_vm2 = vcmask 785927   ;;  %v297_v2 = vld [vmem:[%s4164_s11] sm:$0xff] }
  0x39   : > { %vm247_vm3 = vsmask.f32 7966  ;;  %vm4170_vm4 = vmand %vm195_vm0, %vm196_vm1  ;;  %v298_v3 = vld [vmem:[%s4164_s11 + $0x8] sm:$0xff]  ;;  %v301_v4 = vld [vmem:[%s4164_s11 + $0x20] sm:$0xff]  ;;  %vm473_vm6 = vcmask 261120   ;;  %s4028_s23 = smov 32  }
  0x3a   : > { %vm4174_vm5 = vmand %vm246_vm2, %vm247_vm3  ;;  %v329_v5 = vpack.c.bf16 %v298_v3, %v297_v2  ;;  %v302_v6 = vld [vmem:[%s4164_s11 + $0x28] sm:$0xff]  ;;  %v299_v7 = vld [vmem:[%s4164_s11 + $0x10] sm:$0xff]  ;;  %vm474_vm7 = vsmask.f32 7938  ;;  %s4029_s4 = smov 64   ;;  %vm190_vm9 = vcmask 785408  }
  0x3b   : > { %v300_v8 = vld [vmem:[%s4164_s11 + $0x18] sm:$0xff]  ;;  %v4184_v9 = vpack.c.bf16 %v302_v6, %v301_v4  ;;  %v201_v13 = vld [vmem:[#allocation2 + $0x10] sm:$0x1]  ;;  %v252_v18 = vld [vmem:[#allocation2 + $0x10] sm:$0x80]  ;;  %vm588_vm10 = vcmask 523520  }
  0x3c   : > { %v330_v10 = vpack.c.bf16 %v300_v8, %v299_v7  ;;  %v198_v11 = vld [vmem:[#allocation2 + $0x8] sm:$0x1]  ;;  %v249_v12 = vld [vmem:[#allocation2 + $0x8] sm:$0x80]  ;;  %540 = vrot.lane.b32.xlu0 %v329_v5, %s4028_s23  ;;  %v346_v14 = vshrl.u32 %v329_v5, 16  ;;  %v349_v15 = vshll.u32 %v329_v5, 16  ;;  %vm4213_vm8 = vmand %vm473_vm6, %vm474_vm7 }
  0x3d   : > { %v199_v16 = vsel %vm4170_vm4, 0, %v198_v11  ;;  %v250_v17 = vsel %vm4174_vm5, 0, %v249_v12  ;;  %544 = vrot.lane.b32.xlu1 %v4184_v9, %s4028_s23  ;;  %v202_v21 = vsel %vm4170_vm4, 0, %v201_v13  ;;  %v253_v22 = vsel %vm4174_vm5, 0, %v252_v18  ;;  %v303_v23 = vld [vmem:[%s4164_s11 + $0x30] sm:$0xff]  ;;  %v304_v24 = vld [vmem:[%s4164_s11 + $0x38] sm:$0xff] }
  0x3e   : > { %200 = vst [vmem:[#allocation2 + $0x8] sm:$0x1] %v199_v16  ;;  %251 = vst [vmem:[#allocation2 + $0x8] sm:$0x80] %v250_v17  ;;  %v353_v19 = vshrl.u32 %v330_v10, 16  ;;  %v356_v20 = vshll.u32 %v330_v10, 16  ;;  %v4205_v36 = vpack.c.bf16 %v304_v24, %v303_v23 }
  0x3f   : > { %v605_v25 = vrot.slane %v349_v15, 1  ;;  %v348_v26 = vrot.slane %v346_v14, 7  ;;  %203 = vst [vmem:[#allocation2 + $0x10] sm:$0x1] %v202_v21  ;;  %254 = vst [vmem:[#allocation2 + $0x10] sm:$0x80] %v253_v22 }
  0x40   : > { %v360_v27 = vshrl.u32 %v4184_v9, 16  ;;  %v204_v28 = vld [vmem:[#allocation2 + $0x18] sm:$0x1]  ;;  %v305_v29 = vld [vmem:[%s4164_s11 + $0x40] sm:$0xff]  ;;  %v355_v30 = vrot.slane %v353_v19, 7  ;;  %v607_v31 = vrot.slane %v356_v20, 1  ;;  %542 = vrot.lane.b32.xlu0 %v330_v10, %s4028_s23 }
  0x41   : > { %v363_v32 = vshll.u32 %v4184_v9, 16  ;;  %v205_v33 = vsel %vm4170_vm4, 0, %v204_v28  ;;  %v255_v34 = vld [vmem:[#allocation2 + $0x18] sm:$0x80]  ;;  %v606_v35 = vor.u32 %v605_v25, %v346_v14  ;;  %v351_v40 = vor.u32 %v349_v15, %v348_v26  ;;  %v307_v43 = vld [vmem:[%s4164_s11 + $0x50] sm:$0xff]  ;;  %v308_v49 = vld [vmem:[%s4164_s11 + $0x58] sm:$0xff] }
  0x42   : > { %v362_v37 = vrot.slane %v360_v27, 7  ;;  %206 = vst [vmem:[#allocation2 + $0x18] sm:$0x1] %v205_v33  ;;  %v256_v38 = vsel %vm4174_vm5, 0, %v255_v34  ;;  %v306_v39 = vld [vmem:[%s4164_s11 + $0x48] sm:$0xff]  ;;  %v358_v41 = vor.u32 %v356_v20, %v355_v30  ;;  %v608_v42 = vor.u32 %v607_v31, %v353_v19  ;;  %v309_v55 = vld [vmem:[%s4164_s11 + $0x60] sm:$0xff] }
  0x43   : > { %257 = vst [vmem:[#allocation2 + $0x18] sm:$0x80] %v256_v38  ;;  %v207_v44 = vld [vmem:[#allocation2 + $0x20] sm:$0x1]  ;;  %v258_v45 = vld [vmem:[#allocation2 + $0x20] sm:$0x80]  ;;  %637 = vrot.lane.b32.xlu1 %v606_v35, %s4029_s4  ;;  %v4218_v48 = vpack.c.bf16 %v306_v39, %v305_v29  ;;  %v4236_v4 = vpack.c.bf16 %v308_v49, %v307_v43 }
  0x44   : > { %v609_v47 = vrot.slane %v363_v32, 1  ;;  %v367_v50 = vshrl.u32 %v4205_v36, 16  ;;  %v370_v51 = vshll.u32 %v4205_v36, 16  ;;  %v210_v52 = vld [vmem:[#allocation2 + $0x28] sm:$0x1]  ;;  %v208_v53 = vsel %vm4170_vm4, 0, %v207_v44  ;;  %546 = vrot.lane.b32.xlu0 %v4205_v36, %s4028_s23 }
  0x45   : > { %v259_v54 = vsel %vm4174_vm5, 0, %v258_v45  ;;  %v261_v56 = vld [vmem:[#allocation2 + $0x28] sm:$0x80]  ;;  %v365_v58 = vor.u32 %v363_v32, %v362_v37  ;;  %209 = vst [vmem:[#allocation2 + $0x20] sm:$0x1] %v208_v53  ;;  %v310_v60 = vld [vmem:[%s4164_s11 + $0x68] sm:$0xff] }
  0x46   : > { %v476_v57 = vld [vmem:[#allocation2 + $0x8] sm:$0xff]  ;;  %v369_v59 = vrot.slane %v367_v50, 7  ;;  %260 = vst [vmem:[#allocation2 + $0x20] sm:$0x80] %v259_v54  ;;  %v374_v61 = vshrl.u32 %v4218_v48, 16  ;;  %v377_v62 = vshll.u32 %v4218_v48, 16  ;;  %v610_v10 = vor.u32 %v609_v47, %v360_v27 }
  0x47   : > { %v311_v63 = vld [vmem:[%s4164_s11 + $0x70] sm:$0xff]  ;;  %v477_v2 = vsel %vm4213_vm8, %v351_v40, %v476_v57  ;;  %v479_v3 = vld [vmem:[#allocation2 + $0x10] sm:$0xff]  ;;  %v211_v5 = vsel %vm4170_vm4, 0, %v210_v52  ;;  %v262_v6 = vsel %vm4174_vm5, 0, %v261_v56  ;;  %v312_v7 = vld [vmem:[%s4164_s11 + $0x78] sm:$0xff]  ;;  %639 = vrot.lane.b32.xlu1 %v608_v42, %s4029_s4  ;;  %v611_v11 = vrot.slane %v370_v51, 1 }
  0x48   : > { %v213_v8 = vld [vmem:[#allocation2 + $0x30] sm:$0x1]  ;;  %478 = vst [vmem:[#allocation2 + $0x8] sm:$0xff] %v477_v2  ;;  %v480_v9 = vsel %vm4213_vm8, %v358_v41, %v479_v3  ;;  %v376_v12 = vrot.slane %v374_v61, 7  ;;  %212 = vst [vmem:[#allocation2 + $0x28] sm:$0x1] %v211_v5  ;;  %v4246_v14 = vpack.c.bf16 %v310_v60, %v309_v55  ;;  %548 = vrot.lane.b32.xlu0 %v4218_v48, %s4028_s23 }
  0x49   : > { %263 = vst [vmem:[#allocation2 + $0x28] sm:$0x80] %v262_v6  ;;  %v264_v13 = vld [vmem:[#allocation2 + $0x30] sm:$0x80]  ;;  %481 = vst [vmem:[#allocation2 + $0x10] sm:$0xff] %v480_v9  ;;  %v381_v15 = vshrl.u32 %v4236_v4, 16  ;;  %v372_v20 = vor.u32 %v370_v51, %v369_v59  ;;  %v4253_v22 = vpack.c.bf16 %v312_v7, %v311_v63  ;;  %v612_v30 = vor.u32 %v611_v11, %v367_v50 }
  0x4a   : > { %v214_v16 = vsel %vm4170_vm4, 0, %v213_v8  ;;  %v216_v17 = vld [vmem:[#allocation2 + $0x38] sm:$0x1]  ;;  %v267_v18 = vld [vmem:[#allocation2 + $0x38] sm:$0x80]  ;;  %v613_v21 = vrot.slane %v377_v62, 1  ;;  %v379_v31 = vor.u32 %v377_v62, %v376_v12 }
  0x4b   : > { %v482_v19 = vld [vmem:[#allocation2 + $0x18] sm:$0xff]  ;;  %215 = vst [vmem:[#allocation2 + $0x30] sm:$0x1] %v214_v16  ;;  %v265_v23 = vsel %vm4174_vm5, 0, %v264_v13  ;;  %v313_v24 = vld [vmem:[%s4164_s11 + $0x80] sm:$0xff]  ;;  %v383_v27 = vrot.slane %v381_v15, 7  ;;  %641 = vrot.lane.b32.xlu1 %v610_v10, %s4029_s4 }
  0x4c   : > { %v314_v25 = vld [vmem:[%s4164_s11 + $0x88] sm:$0xff]  ;;  %v483_v26 = vsel %vm4213_vm8, %v365_v58, %v482_v19  ;;  %v384_v28 = vshll.u32 %v4236_v4, 16  ;;  %266 = vst [vmem:[#allocation2 + $0x30] sm:$0x80] %v265_v23  ;;  %v388_v29 = vshrl.u32 %v4246_v14, 16  ;;  %v217_v32 = vsel %vm4170_vm4, 0, %v216_v17  ;;  %550 = vrot.lane.b32.xlu0 %v4236_v4, %s4028_s23 }
  0x4d   : > { %484 = vst [vmem:[#allocation2 + $0x18] sm:$0xff] %v483_v26  ;;  %v268_v33 = vsel %vm4174_vm5, 0, %v267_v18  ;;  %v219_v34 = vld [vmem:[#allocation2 + $0x40] sm:$0x1]  ;;  %v270_v35 = vld [vmem:[#allocation2 + $0x40] sm:$0x80]  ;;  %v4270_v37 = vpack.c.bf16 %v314_v25, %v313_v24  ;;  %v614_v42 = vor.u32 %v613_v21, %v374_v61 }
  0x4e   : > { %v485_v36 = vld [vmem:[#allocation2 + $0x20] sm:$0xff]  ;;  %v390_v38 = vrot.slane %v388_v29, 7  ;;  %218 = vst [vmem:[#allocation2 + $0x38] sm:$0x1] %v217_v32  ;;  %269 = vst [vmem:[#allocation2 + $0x38] sm:$0x80] %v268_v33  ;;  %v386_v49 = vor.u32 %v384_v28, %v383_v27 }
  0x4f   : > { %v315_v39 = vld [vmem:[%s4164_s11 + $0x90] sm:$0xff]  ;;  %v316_v40 = vld [vmem:[%s4164_s11 + $0x98] sm:$0xff]  ;;  %v486_v41 = vsel %vm4213_vm8, %v372_v20, %v485_v36  ;;  %v391_v43 = vshll.u32 %v4246_v14, 16  ;;  %v395_v44 = vshrl.u32 %v4253_v22, 16  ;;  %v615_v50 = vrot.slane %v384_v28, 1  ;;  %v317_v53 = vld [vmem:[%s4164_s11 + $0xa0] sm:$0xff]  ;;  %643 = vrot.lane.b32.xlu1 %v612_v30, %s4029_s4 }
  0x50   : > { %v222_v45 = vld [vmem:[#allocation2 + $0x48] sm:$0x1]  ;;  %v273_v47 = vld [vmem:[#allocation2 + $0x48] sm:$0x80]  ;;  %487 = vst [vmem:[#allocation2 + $0x20] sm:$0xff] %v486_v41  ;;  %v220_v51 = vsel %vm4170_vm4, 0, %v219_v34  ;;  %v4295_v61 = vpack.c.bf16 %v316_v40, %v315_v39  ;;  %552 = vrot.lane.b32.xlu0 %v4246_v14, %s4028_s23 }
  0x51   : > { %v488_v48 = vld [vmem:[#allocation2 + $0x28] sm:$0xff]  ;;  %v271_v52 = vsel %vm4174_vm5, 0, %v270_v35  ;;  %v318_v54 = vld [vmem:[%s4164_s11 + $0xa8] sm:$0xff]  ;;  %v397_v56 = vrot.slane %v395_v44, 7  ;;  %v398_v57 = vshll.u32 %v4253_v22, 16  ;;  %v402_v58 = vshrl.u32 %v4270_v37, 16 }
  0x52   : > { %v489_v55 = vsel %vm4213_vm8, %v379_v31, %v488_v48  ;;  %221 = vst [vmem:[#allocation2 + $0x40] sm:$0x1] %v220_v51  ;;  %272 = vst [vmem:[#allocation2 + $0x40] sm:$0x80] %v271_v52  ;;  %v225_v59 = vld [vmem:[#allocation2 + $0x50] sm:$0x1]  ;;  %v393_v60 = vor.u32 %v391_v43, %v390_v38  ;;  %v4303_v6 = vpack.c.bf16 %v318_v54, %v317_v53 }
  0x53   : > { %490 = vst [vmem:[#allocation2 + $0x28] sm:$0xff] %v489_v55  ;;  %v223_v62 = vsel %vm4170_vm4, 0, %v222_v45  ;;  %v274_v63 = vsel %vm4174_vm5, 0, %v273_v47  ;;  %v276_v2 = vld [vmem:[#allocation2 + $0x50] sm:$0x80]  ;;  %v617_v5 = vrot.slane %v391_v43, 1  ;;  %645 = vrot.lane.b32.xlu1 %v614_v42, %s4029_s4  ;;  %v616_v18 = vor.u32 %v615_v50, %v381_v15 }
  0x54   : > { %v491_v3 = vld [vmem:[#allocation2 + $0x30] sm:$0xff]  ;;  %v404_v7 = vrot.slane %v402_v58, 7  ;;  %224 = vst [vmem:[#allocation2 + $0x48] sm:$0x1] %v223_v62  ;;  %275 = vst [vmem:[#allocation2 + $0x48] sm:$0x80] %v274_v63  ;;  %v400_v20 = vor.u32 %v398_v57, %v397_v56  ;;  %554 = vrot.lane.b32.xlu0 %v4253_v22, %s4028_s23 }
  0x55   : > { %v319_v8 = vld [vmem:[%s4164_s11 + $0xb0] sm:$0xff]  ;;  %v228_v9 = vld [vmem:[#allocation2 + $0x58] sm:$0x1]  ;;  %v492_v10 = vsel %vm4213_vm8, %v386_v49, %v491_v3  ;;  %v405_v11 = vshll.u32 %v4270_v37, 16  ;;  %v320_v12 = vld [vmem:[%s4164_s11 + $0xb8] sm:$0xff]  ;;  %v409_v13 = vshrl.u32 %v4295_v61, 16  ;;  %v618_v39 = vor.u32 %v617_v5, %v388_v29 }
  0x56   : > { %v226_v16 = vsel %vm4170_vm4, 0, %v225_v59  ;;  %v279_v17 = vld [vmem:[#allocation2 + $0x58] sm:$0x80]  ;;  %493 = vst [vmem:[#allocation2 + $0x30] sm:$0xff] %v492_v10  ;;  %v4318_v21 = vrot.slane %v398_v57, 1  ;;  %v277_v23 = vsel %vm4174_vm5, 0, %v276_v2  ;;  %v4333_v32 = vpack.c.bf16 %v320_v12, %v319_v8 }
  0x57   : > { %v494_v19 = vld [vmem:[#allocation2 + $0x38] sm:$0xff]  ;;  %227 = vst [vmem:[#allocation2 + $0x50] sm:$0x1] %v226_v16  ;;  %v321_v24 = vld [vmem:[%s4164_s11 + $0xc0] sm:$0xff]  ;;  %v411_v27 = vrot.slane %v409_v13, 7  ;;  %v412_v4 = vshll.u32 %v4295_v61, 16  ;;  %v407_v31 = vor.u32 %v405_v11, %v404_v7  ;;  %647 = vrot.lane.b32.xlu1 %v616_v18, %s4029_s4 }
  0x58   : > { %v322_v25 = vld [vmem:[%s4164_s11 + $0xc8] sm:$0xff]  ;;  %v495_v26 = vsel %vm4213_vm8, %v393_v60, %v494_v19  ;;  %278 = vst [vmem:[#allocation2 + $0x50] sm:$0x80] %v277_v23  ;;  %v416_v15 = vshrl.u32 %v4303_v6, 16  ;;  %v323_v28 = vld [vmem:[%s4164_s11 + $0xd0] sm:$0xff]  ;;  %v229_v33 = vsel %vm4170_vm4, 0, %v228_v9  ;;  %556 = vrot.lane.b32.xlu0 %v4270_v37, %s4028_s23  ;;  %v620_v16 = vor.u32 %v4318_v21, %v395_v44 }
  0x59   : > { %v231_v30 = vld [vmem:[#allocation2 + $0x60] sm:$0x1]  ;;  %496 = vst [vmem:[#allocation2 + $0x38] sm:$0xff] %v495_v26  ;;  %v280_v34 = vsel %vm4174_vm5, 0, %v279_v17  ;;  %v324_v35 = vld [vmem:[%s4164_s11 + $0xd8] sm:$0xff]  ;;  %v3859_v38 = vld [vmem:[%s5239_s1 + $0x30] sm:$0xff]   ;;  %v4353_v48 = vpack.c.bf16 %v322_v25, %v321_v24  ;;  %v414_v54 = vor.u32 %v412_v4, %v411_v27 }
  0x5a   : > { %v282_v36 = vld [vmem:[#allocation2 + $0x60] sm:$0x80]  ;;  %v621_v41 = vrot.slane %v405_v11, 1  ;;  %v418_v42 = vrot.slane %v416_v15, 7  ;;  %230 = vst [vmem:[#allocation2 + $0x58] sm:$0x1] %v229_v33  ;;  %3414 = vmatprep.subr.bf16.mxu0 %v3859_v38  ;;  %v4369_v62 = vpack.c.bf16 %v324_v35, %v323_v28 }
  0x5b   : > { %v497_v40 = vld [vmem:[#allocation2 + $0x40] sm:$0xff]  ;;  %281 = vst [vmem:[#allocation2 + $0x58] sm:$0x80] %v280_v34  ;;  %v234_v43 = vld [vmem:[#allocation2 + $0x68] sm:$0x1]  ;;  %v3860_v45 = vld [vmem:[%s5239_s1 + $0x38] sm:$0xff]   ;;  %3415 = vmatpush3.bf16.msra.mxu0 %v3859_v38  ;;  %649 = vrot.lane.b32.xlu1 %v618_v39, %s4029_s4 }
  0x5c   : > { %v498_v47 = vsel %vm4213_vm8, %v400_v20, %v497_v40  ;;  %v423_v14 = vshrl.u32 %v4333_v32, 16  ;;  %v232_v29 = vsel %vm4170_vm4, 0, %v231_v30  ;;  %v325_v49 = vld [vmem:[%s4164_s11 + $0xe0] sm:$0xff]  ;;  %v326_v50 = vld [vmem:[%s4164_s11 + $0xe8] sm:$0xff]  ;;  %v285_v51 = vld [vmem:[#allocation2 + $0x68] sm:$0x80]  ;;  %3416 = vmatprep.subr.bf16.mxu0 %v3860_v45  ;;  %558 = vrot.lane.b32.xlu0 %v4295_v61, %s4028_s23  ;;  %v622_v44 = vor.u32 %v621_v41, %v402_v58 }
  0x5d   : > { %v237_v52 = vld [vmem:[#allocation2 + $0x70] sm:$0x1]  ;;  %499 = vst [vmem:[#allocation2 + $0x40] sm:$0xff] %v498_v47  ;;  %v500_v53 = vld [vmem:[#allocation2 + $0x48] sm:$0xff]  ;;  %v4360_v55 = vrot.slane %v412_v4, 1  ;;  %v419_v56 = vshll.u32 %v4303_v6, 16  ;;  %v4392_v23 = vpack.c.bf16 %v326_v50, %v325_v49 }
  0x5e   : > { %233 = vst [vmem:[#allocation2 + $0x60] sm:$0x1] %v232_v29  ;;  %v283_v57 = vsel %vm4174_vm5, 0, %v282_v36  ;;  %v288_v59 = vld [vmem:[#allocation2 + $0x70] sm:$0x80]  ;;  %v501_v60 = vsel %vm4213_vm8, %v407_v31, %v500_v53  ;;  %v425_v63 = vrot.slane %v423_v14, 7 }
  0x5f   : > { %284 = vst [vmem:[#allocation2 + $0x60] sm:$0x80] %v283_v57  ;;  %v430_v2 = vshrl.u32 %v4353_v48, 16  ;;  %v327_v3 = vld [vmem:[%s4164_s11 + $0xf0] sm:$0xff]  ;;  %502 = vst [vmem:[#allocation2 + $0x48] sm:$0xff] %v501_v60  ;;  %v421_v7 = vor.u32 %v419_v56, %v418_v42  ;;  %v426_v8 = vshll.u32 %v4333_v32, 16  ;;  %3417 = vmatpush3.bf16.msra.mxu0 %v3860_v45  ;;  %651 = vrot.lane.b32.xlu1 %v620_v16, %s4029_s4 }
  0x60   : > { %v3861_v5 = vld [vmem:[%s5239_s1 + $0x40] sm:$0xff]   ;;  %v235_v9 = vsel %vm4170_vm4, 0, %v234_v43  ;;  %v286_v10 = vsel %vm4174_vm5, 0, %v285_v51  ;;  %v328_v11 = vld [vmem:[%s4164_s11 + $0xf8] sm:$0xff]  ;;  %v240_v12 = vld [vmem:[#allocation2 + $0x78] sm:$0x1]  ;;  %560 = vrot.lane.b32.xlu0 %v4303_v6, %s4028_s23  ;;  %v624_v0 = vor.u32 %v4360_v55, %v409_v13 }
  0x61   : > { %v503_v17 = vld [vmem:[#allocation2 + $0x50] sm:$0xff]  ;;  %v432_v18 = vrot.slane %v430_v2, 7  ;;  %236 = vst [vmem:[#allocation2 + $0x68] sm:$0x1] %v235_v9  ;;  %287 = vst [vmem:[#allocation2 + $0x68] sm:$0x80] %v286_v10  ;;  %v428_v27 = vor.u32 %v426_v8, %v425_v63  ;;  %3418 = vmatprep.subr.bf16.mxu0 %v3861_v5  ;;  %v4411_v58 = vpack.c.bf16 %v328_v11, %v327_v3 }
  0x62   : > { %v291_v19 = vld [vmem:[#allocation2 + $0x78] sm:$0x80]  ;;  %v504_v20 = vsel %vm4213_vm8, %v414_v54, %v503_v17  ;;  %v437_v24 = vshrl.u32 %v4369_v62, 16  ;;  %v238_v25 = vsel %vm4170_vm4, 0, %v237_v52  ;;  %v243_v22 = vld [vmem:[#allocation2 + $0x80] sm:$0x1] }
  0x63   : > { %v294_v26 = vld [vmem:[#allocation2 + $0x80] sm:$0x80]  ;;  %505 = vst [vmem:[#allocation2 + $0x50] sm:$0xff] %v504_v20  ;;  %v506_v21 = vld [vmem:[#allocation2 + $0x58] sm:$0xff]  ;;  %v433_v4 = vshll.u32 %v4353_v48, 16  ;;  %v289_v28 = vsel %vm4174_vm5, 0, %v288_v59  ;;  %3419 = vmatpush3.bf16.msra.mxu0 %v3861_v5  ;;  %653 = vrot.lane.b32.xlu1 %v622_v44, %s4029_s4 }
  0x64   : > { %239 = vst [vmem:[#allocation2 + $0x70] sm:$0x1] %v238_v25  ;;  %v3862_v30 = vld [vmem:[%s5239_s1 + $0x48] sm:$0xff]   ;;  %v507_v37 = vsel %vm4213_vm8, %v421_v7, %v506_v21  ;;  %v439_v31 = vrot.slane %v437_v24, 7  ;;  %290 = vst [vmem:[#allocation2 + $0x70] sm:$0x80] %v289_v28  ;;  %562 = vrot.lane.b32.xlu0 %v4333_v32, %s4028_s23 }
  0x65   : > { %v444_v33 = vshrl.u32 %v4392_v23, 16  ;;  %v625_v34 = vrot.slane %v419_v56, 1  ;;  %508 = vst [vmem:[#allocation2 + $0x58] sm:$0xff] %v507_v37  ;;  %v435_v35 = vor.u32 %v433_v4, %v432_v18  ;;  %v241_v36 = vsel %vm4170_vm4, 0, %v240_v12  ;;  %v3863_v39 = vld [vmem:[%s5239_s1 + $0x50] sm:$0xff]   ;;  %3420 = vmatprep.subr.bf16.mxu0 %v3862_v30  ;;  %v3864_v54 = vld [vmem:[%s5239_s1 + $0x58] sm:$0xff]  }
  0x66   : > { %v292_v38 = vsel %vm4174_vm5, 0, %v291_v19  ;;  %v509_v40 = vld [vmem:[#allocation2 + $0x60] sm:$0xff]  ;;  %v440_v41 = vshll.u32 %v4369_v62, 16  ;;  %242 = vst [vmem:[#allocation2 + $0x78] sm:$0x1] %v241_v36  ;;  %v451_v43 = vshrl.u32 %v4411_v58, 16 }
  0x67   : > { %v446_v42 = vrot.slane %v444_v33, 7  ;;  %293 = vst [vmem:[#allocation2 + $0x78] sm:$0x80] %v292_v38  ;;  %v510_v45 = vsel %vm4213_vm8, %v428_v27, %v509_v40  ;;  %v244_v47 = vsel %vm4170_vm4, 0, %v243_v22  ;;  %v295_v29 = vsel %vm4174_vm5, 0, %v294_v26  ;;  %3421 = vmatpush3.bf16.msra.mxu0 %v3862_v30  ;;  %655 = vrot.lane.b32.xlu1 %v624_v0, %s4029_s4  ;;  %v3865_v63 = vld [vmem:[%s5239_s1] sm:$0xff]  }
  0x68   : > { %511 = vst [vmem:[#allocation2 + $0x60] sm:$0xff] %v510_v45  ;;  %v512_v49 = vld [vmem:[#allocation2 + $0x68] sm:$0xff]  ;;  %v442_v50 = vor.u32 %v440_v41, %v439_v31  ;;  %v447_v51 = vshll.u32 %v4392_v23, 16  ;;  %v453_v52 = vrot.slane %v451_v43, 7  ;;  %v454_v53 = vshll.u32 %v4411_v58, 16  ;;  %3422 = vmatprep.subr.bf16.mxu0 %v3863_v39  ;;  %564 = vrot.lane.b32.xlu0 %v4353_v48, %s4028_s23  ;;  %v3867_v37 = vld [vmem:[%s5239_s1 + $0x10] sm:$0xff]  }
  0x69   : > { %245 = vst [vmem:[#allocation2 + $0x80] sm:$0x1] %v244_v47  ;;  %296 = vst [vmem:[#allocation2 + $0x80] sm:$0x80] %v295_v29  ;;  %v513_v1 = vsel %vm4213_vm8, %v435_v35, %v512_v49  ;;  %v626_v13 = vor.u32 %v625_v34, %v416_v15  ;;  %v627_v55 = vrot.slane %v426_v8, 1  ;;  %v629_v5 = vrot.slane %v433_v4, 1 }
  0x6a   : > { %514 = vst [vmem:[#allocation2 + $0x68] sm:$0xff] %v513_v1  ;;  %v449_v56 = vor.u32 %v447_v51, %v446_v42  ;;  %v456_v59 = vor.u32 %v454_v53, %v453_v52  ;;  %v631_v8 = vrot.slane %v440_v41, 1  ;;  %v633_v10 = vrot.slane %v447_v51, 1  ;;  %v3866_v26 = vld [vmem:[%s5239_s1 + $0x8] sm:$0xff]   ;;  %v3868_v35 = vld [vmem:[%s5239_s1 + $0x18] sm:$0xff]   ;;  %v3869_v41 = vld [vmem:[%s5239_s1 + $0x20] sm:$0xff]  }
  0x6b   : > { %v515_v57 = vld [vmem:[#allocation2 + $0x70] sm:$0xff]  ;;  %3423 = vmatpush3.bf16.msra.mxu0 %v3863_v39  ;;  %657 = vrot.lane.b32.xlu1 %v626_v13, %s4029_s4  ;;  %v628_v7 = vor.u32 %v627_v55, %v423_v14  ;;  %v630_v9 = vor.u32 %v629_v5, %v430_v2  ;;  %v635_v14 = vrot.slane %v454_v53, 1  ;;  %v4030_v11 = vmov 0   ;;  %v3870_v29 = vld [vmem:[%s5239_s1 + $0x28] sm:$0xff]   ;;  %v3871_v53 = vld [vmem:[%s5239_s1 + $0x60] sm:$0xff]   ;;  %s5063_s26 = scalar_lea.vmem [#allocation6], %s3139_s9 }
  0x6c   : > { %v516_v61 = vsel %vm4213_vm8, %v442_v50, %v515_v57  ;;  %3424 = vmatprep.subr.bf16.mxu0 %v3864_v54  ;;  %566 = vrot.lane.b32.xlu0 %v4369_v62, %s4028_s23  ;;  %v632_v32 = vor.u32 %v631_v8, %v437_v24  ;;  %191 = vst.msk [vmem:[#allocation2] sm:$0xff] %vm190_vm9, %v4030_v11  ;;  %193 = vst.msk [vmem:[#allocation2 + $0x88] sm:$0xff] %vm190_vm9, %v4030_v11  ;;  %vm685_vm11 = vcmask 785920   ;;  %vm686_vm12 = vsmask.f32 7424  ;;  %v3891_v17 = vld [vmem:[%s5239_s1 + $0x70] sm:$0xff]  }
  0x6d   : > { %517 = vst [vmem:[#allocation2 + $0x70] sm:$0xff] %v516_v61  ;;  %v634_v48 = vor.u32 %v633_v10, %v444_v33  ;;  %v636_v2 = vor.u32 %v635_v14, %v451_v43  ;;  %vm4490_vm13 = vmand %vm685_vm11, %vm686_vm12  ;;  %s3281_s9 = sshll.u32 %s4075_s16, 12  ;;  %s3059_s27 = sshll.u32 %s5063_s26, 4  ;;  %s5187_s27 = int_to_ptr.vmem [resolvable:$true] %s3059_s27 }
  0x6e   : > { %v518_v60 = vld [vmem:[#allocation2 + $0x78] sm:$0xff]  ;;  %s5185_s30 = scalar_lea.hbm %s5241_s3, %s3281_s9  ;;  %s3046_s16 = scalar_lea.sflag [#allocation5], %s4158_s5 }
  0x6f   : > { %v519_v3 = vsel %vm4213_vm8, %v449_v56, %v518_v60  ;;  %3425 = vmatpush3.bf16.msra.mxu0 %v3864_v54  ;;  %659 = vrot.lane.b32.xlu1 %v628_v7, %s4029_s4  ;;  %s3957_s10 = scalar_lea.vmem %s5187_s27, 4096  ;;  %p5256_p11 = scmp.ne.s32.totalorder %s5245_s24, 0 }
  0x70   : > { %520 = vst [vmem:[#allocation2 + $0x78] sm:$0xff] %v519_v3  ;;  %v521_v6 = vld [vmem:[#allocation2 + $0x80] sm:$0xff]  ;;  %3458 = vmatprep.subr.bf16.mxu0 %v3865_v63  ;;  %568 = vrot.lane.b32.xlu0 %v4392_v23, %s4028_s23  ;;  %p3958_p6 = scmp.ne.s32.totalorder %s5187_s27, %s3957_s10 }
  0x71   : > { %v522_v15 = vsel %vm4213_vm8, %v456_v59, %v521_v6 }
  0x72   : > { %523 = vst [vmem:[#allocation2 + $0x80] sm:$0xff] %v522_v15  ;;  %p3959_p12 = pnand %p3958_p6, %p5256_p11 }
  0x73   : > { %661 = vrot.lane.b32.xlu1 %v630_v9, %s4029_s4 }
  0x74   : > { %570 = vrot.lane.b32.xlu0 %v4411_v58, %s4028_s23  ;;  %p3960_p13 = pneg %p3959_p12 }
  0x77   : > { %663 = vrot.lane.b32.xlu1 %v632_v32, %s4029_s4 }
  0x78   : > { %665 = vrot.lane.b32.xlu0 %v634_v48, %s4029_s4 }
  0x7b   : > { %667 = vrot.lane.b32.xlu1 %v636_v2, %s4029_s4 }
  0xae   : > { %v541_v62 = vpop.permute.xlu0 %540 }
  0xaf   : > { %589 = vst.msk [vmem:[#allocation2 + $0x8] sm:$0xff] %vm588_vm10, %v541_v62  ;;  %v545_v12 = vpop.permute.xlu1 %544 }
  0xb0   : > { %591 = vst.msk [vmem:[#allocation2 + $0x18] sm:$0xff] %vm588_vm10, %v545_v12 }
  0xb2   : > { %v543_v16 = vpop.permute.xlu0 %542 }
  0xb3   : > { %590 = vst.msk [vmem:[#allocation2 + $0x10] sm:$0xff] %vm588_vm10, %v543_v16 }
  0xb5   : > { %v638_v18 = vpop.permute.xlu1 %637 }
  0xb6   : > { %v688_v19 = vld [vmem:[#allocation2 + $0x8] sm:$0xff]  ;;  %v547_v20 = vpop.permute.xlu0 %546 }
  0xb7   : > { %v4496_v23 = vsel %vm4490_vm13, %v638_v18, %v688_v19  ;;  %592 = vst.msk [vmem:[#allocation2 + $0x20] sm:$0xff] %vm588_vm10, %v547_v20  ;;  %v694_v27 = vld [vmem:[#allocation2 + $0x18] sm:$0xff] }
  0xb8   : > { %3426 = vmatprep.mubr.msk.bf16.mxu0 %vm190_vm9, %v4496_v23 }
  0xb9   : > { %v640_v24 = vpop.permute.xlu1 %639 }
  0xba   : > { %v691_v25 = vld [vmem:[#allocation2 + $0x10] sm:$0xff]  ;;  %v549_v22 = vpop.permute.xlu0 %548 }
  0xbb   : > { %v4506_v44 = vsel %vm4490_vm13, %v640_v24, %v691_v25  ;;  %593 = vst.msk [vmem:[#allocation2 + $0x28] sm:$0xff] %vm588_vm10, %v549_v22  ;;  %v736_v22 = vld [vmem:[#allocation2] sm:$0xff] }
  0xbc   : > { %3427 = vmatmul.mubr.msk.bf16.vlgmr.msra.gmra.mrb[0].mxu0 %vm190_vm9, %v4506_v44 }
  0xbd   : > { %v642_v21 = vpop.permute.xlu1 %641  ;;  %3459 = vmatpush3.bf16.msra.mxu0 %v3865_v63 }
  0xbe   : > { %v4513_v4 = vsel %vm4490_vm13, %v642_v21, %v694_v27  ;;  %v551_v28 = vpop.permute.xlu0 %550  ;;  %v697_v30 = vld [vmem:[#allocation2 + $0x20] sm:$0xff]  ;;  %3460 = vmatprep.subr.bf16.mxu0 %v3866_v26  ;;  %v3873_v21 = vld [vmem:[%s5239_s1 + $0x70] sm:$0xff]   ;;  %v3874_v27 = vld [vmem:[%s5239_s1 + $0x78] sm:$0xff]  }
  0xbf   : > { %3430 = vmatprep.mubr.msk.bf16.mxu0 %vm190_vm9, %v4513_v4  ;;  %594 = vst.msk [vmem:[#allocation2 + $0x30] sm:$0xff] %vm588_vm10, %v551_v28  ;;  %v3875_v28 = vld [vmem:[%s5239_s1 + $0x80] sm:$0xff]  }
  0xc1   : > { %v644_v58 = vpop.permute.xlu1 %643  ;;  %3461 = vmatpush3.bf16.msra.mxu0 %v3866_v26  ;;  %v3872_v26 = vld [vmem:[%s5239_s1 + $0x68] sm:$0xff]  }
  0xc2   : > { %v4523_v31 = vsel %vm4490_vm13, %v644_v58, %v697_v30  ;;  %v553_v33 = vpop.permute.xlu0 %552  ;;  %v700_v34 = vld [vmem:[#allocation2 + $0x28] sm:$0xff]  ;;  %3462 = vmatprep.subr.bf16.mxu0 %v3867_v37  ;;  %v3877_v58 = vld [vmem:[%s5239_s1 + $0x30] sm:$0xff]  }
  0xc3   : > { %595 = vst.msk [vmem:[#allocation2 + $0x38] sm:$0xff] %vm588_vm10, %v553_v33  ;;  %v3876_v30 = vld [vmem:[%s5239_s1 + $0x88] sm:$0xff]   ;;  %3546 = vmatprep.subr.bf16.mxu1 %v3877_v58  ;;  %v3878_v33 = vld [vmem:[%s5239_s1 + $0x38] sm:$0xff]  }
  0xc4   : > { %3431 = vmatmul.mubr.msk.bf16.gmra.mrb[4].mxu0 %vm190_vm9, %v4523_v31  ;;  %3547 = vmatpush3.bf16.msra.mxu1 %v3877_v58 }
  0xc5   : > { %v646_v36 = vpop.permute.xlu1 %645  ;;  %3463 = vmatpush3.bf16.msra.mxu0 %v3867_v37  ;;  %v1298_v37 = vld [vmem:[#allocation2 + $0x88] sm:$0xff]  ;;  %3548 = vmatprep.subr.bf16.mxu1 %v3878_v33 }
  0xc6   : > { %v4533_v38 = vsel %vm4490_vm13, %v646_v36, %v700_v34  ;;  %v555_v39 = vpop.permute.xlu0 %554  ;;  %v703_v40 = vld [vmem:[#allocation2 + $0x30] sm:$0xff]  ;;  %3464 = vmatprep.subr.bf16.mxu0 %v3868_v35  ;;  %v3879_v34 = vld [vmem:[%s5239_s1 + $0x40] sm:$0xff]  }
  0xc7   : > { %3434 = vmatprep.mubr.msk.bf16.mxu0 %vm190_vm9, %v4533_v38  ;;  %596 = vst.msk [vmem:[#allocation2 + $0x40] sm:$0xff] %vm588_vm10, %v555_v39  ;;  %v4713_v36 = vld [vmem:[%s5240_s2] ss:$0 sm:$0xff]  ;;  %v3881_v39 = vld [vmem:[%s5239_s1 + $0x50] sm:$0xff]  }
  0xc8   : > { %3549 = vmatpush3.bf16.msra.mxu1 %v3878_v33 }
  0xc9   : > { %v648_v42 = vpop.permute.xlu1 %647  ;;  %3465 = vmatpush3.bf16.msra.mxu0 %v3868_v35  ;;  %3550 = vmatprep.subr.bf16.mxu1 %v3879_v34  ;;  %v3880_v35 = vld [vmem:[%s5239_s1 + $0x48] sm:$0xff]  }
  0xca   : > { %v4543_v43 = vsel %vm4490_vm13, %v648_v42, %v703_v40  ;;  %v557_v45 = vpop.permute.xlu0 %556  ;;  %v706_v47 = vld [vmem:[#allocation2 + $0x38] sm:$0xff]  ;;  %3466 = vmatprep.subr.bf16.mxu0 %v3869_v41 }
  0xcb   : > { %597 = vst.msk [vmem:[#allocation2 + $0x48] sm:$0xff] %vm588_vm10, %v557_v45 }
  0xcc   : > { %3435 = vmatmul.mubr.msk.bf16.gmra.mrb[8].mxu0 %vm190_vm9, %v4543_v43  ;;  %3551 = vmatpush3.bf16.msra.mxu1 %v3879_v34 }
  0xcd   : > { %v650_v49 = vpop.permute.xlu1 %649  ;;  %3467 = vmatpush3.bf16.msra.mxu0 %v3869_v41  ;;  %3552 = vmatprep.subr.bf16.mxu1 %v3880_v35 }
  0xce   : > { %v4553_v50 = vsel %vm4490_vm13, %v650_v49, %v706_v47  ;;  %v559_v51 = vpop.permute.xlu0 %558  ;;  %v709_v52 = vld [vmem:[#allocation2 + $0x40] sm:$0xff]  ;;  %3468 = vmatprep.subr.bf16.mxu0 %v3870_v29 }
  0xcf   : > { %3438 = vmatprep.mubr.msk.bf16.mxu0 %vm190_vm9, %v4553_v50  ;;  %598 = vst.msk [vmem:[#allocation2 + $0x50] sm:$0xff] %vm588_vm10, %v559_v51 }
  0xd0   : > { %3553 = vmatpush3.bf16.msra.mxu1 %v3880_v35 }
  0xd1   : > { %v652_v0 = vpop.permute.xlu1 %651  ;;  %3469 = vmatpush3.bf16.msra.mxu0 %v3870_v29  ;;  %3554 = vmatprep.subr.bf16.mxu1 %v3881_v39  ;;  %v3882_v29 = vld [vmem:[%s5239_s1 + $0x58] sm:$0xff]  }
  0xd2   : > { %v4563_v1 = vsel %vm4490_vm13, %v652_v0, %v709_v52  ;;  %v561_v54 = vpop.permute.xlu0 %560  ;;  %v712_v56 = vld [vmem:[#allocation2 + $0x48] sm:$0xff]  ;;  %3502 = vmatprep.subr.bf16.mxu0 %v3871_v53 }
  0xd3   : > { %599 = vst.msk [vmem:[#allocation2 + $0x58] sm:$0xff] %vm588_vm10, %v561_v54 }
  0xd4   : > { %3439 = vmatmul.mubr.msk.bf16.gmra.mrb[12].mxu0 %vm190_vm9, %v4563_v1  ;;  %3555 = vmatpush3.bf16.msra.mxu1 %v3881_v39 }
  0xd5   : > { %v654_v57 = vpop.permute.xlu1 %653  ;;  %3556 = vmatprep.subr.bf16.mxu1 %v3882_v29 }
  0xd6   : > { %v4570_v61 = vsel %vm4490_vm13, %v654_v57, %v712_v56  ;;  %v563_v59 = vpop.permute.xlu0 %562  ;;  %v715_v13 = vld [vmem:[#allocation2 + $0x50] sm:$0xff] }
  0xd7   : > { %3442 = vmatprep.mubr.msk.bf16.mxu0 %vm190_vm9, %v4570_v61  ;;  %600 = vst.msk [vmem:[#allocation2 + $0x60] sm:$0xff] %vm588_vm10, %v563_v59 }
  0xd8   : > { %3557 = vmatpush3.bf16.msra.mxu1 %v3882_v29 }
  0xd9   : > { %v656_v55 = vpop.permute.xlu1 %655 }
  0xda   : > { %v4577_v60 = vsel %vm4490_vm13, %v656_v55, %v715_v13  ;;  %v565_v63 = vpop.permute.xlu0 %564  ;;  %v718_v3 = vld [vmem:[#allocation2 + $0x58] sm:$0xff] }
  0xdb   : > { %601 = vst.msk [vmem:[#allocation2 + $0x68] sm:$0xff] %vm588_vm10, %v565_v63 }
  0xdc   : > { %3443 = vmatmul.mubr.msk.bf16.gmra.mrb[16].mxu0 %vm190_vm9, %v4577_v60 }
  0xdd   : > { %v658_v5 = vpop.permute.xlu1 %657 }
  0xde   : > { %v4584_v6 = vsel %vm4490_vm13, %v658_v5, %v718_v3  ;;  %v567_v15 = vpop.permute.xlu0 %566  ;;  %v721_v7 = vld [vmem:[#allocation2 + $0x60] sm:$0xff] }
  0xdf   : > { %3446 = vmatprep.mubr.msk.bf16.mxu0 %vm190_vm9, %v4584_v6  ;;  %602 = vst.msk [vmem:[#allocation2 + $0x70] sm:$0xff] %vm588_vm10, %v567_v15 }
  0xe1   : > { %v660_v8 = vpop.permute.xlu1 %659 }
  0xe2   : > { %v4591_v9 = vsel %vm4490_vm13, %v660_v8, %v721_v7  ;;  %v569_v10 = vpop.permute.xlu0 %568  ;;  %v724_v32 = vld [vmem:[#allocation2 + $0x68] sm:$0xff] }
  0xe3   : > { %603 = vst.msk [vmem:[#allocation2 + $0x78] sm:$0xff] %vm588_vm10, %v569_v10 }
  0xe4   : > { %3447 = vmatmul.mubr.msk.bf16.gmra.mrb[20].mxu0 %vm190_vm9, %v4591_v9 }
  0xe5   : > { %v662_v14 = vpop.permute.xlu1 %661 }
  0xe6   : > { %v4598_v11 = vsel %vm4490_vm13, %v662_v14, %v724_v32  ;;  %v571_v48 = vpop.permute.xlu0 %570  ;;  %v727_v2 = vld [vmem:[#allocation2 + $0x70] sm:$0xff] }
  0xe7   : > { %3450 = vmatprep.mubr.msk.bf16.mxu0 %vm190_vm9, %v4598_v11  ;;  %604 = vst.msk [vmem:[#allocation2 + $0x80] sm:$0xff] %vm588_vm10, %v571_v48 }
  0xe9   : > { %v664_v62 = vpop.permute.xlu1 %663 }
  0xea   : > { %v4605_v12 = vsel %vm4490_vm13, %v664_v62, %v727_v2  ;;  %v666_v16 = vpop.permute.xlu0 %665  ;;  %v730_v18 = vld [vmem:[#allocation2 + $0x78] sm:$0xff] }
  0xeb   : > { %v4609_v19 = vsel %vm4490_vm13, %v666_v16, %v730_v18 }
  0xec   : > { %3451 = vmatmul.mubr.msk.bf16.gmra.mrb[24].mxu0 %vm190_vm9, %v4605_v12 }
  0xed   : > { %3454 = vmatprep.mubr.msk.bf16.mxu0 %vm190_vm9, %v4609_v19  ;;  %v668_v20 = vpop.permute.xlu1 %667 }
  0xee   : > { %v733_v24 = vld [vmem:[#allocation2 + $0x80] sm:$0xff] }
  0xef   : > { %v4617_v25 = vsel %vm4490_vm13, %v668_v20, %v733_v24 }
  0xf4   : > { %3455 = vmatmul.mubr.msk.bf16.gmra.mrb[28].mxu0 %vm190_vm9, %v4617_v25 }
  0xf5   : > { %3470 = vmatprep.mubr.msk.bf16.mxu0 %vm190_vm9, %v736_v22 }
  0xfc   : > { %3471 = vmatmul.mubr.msk.bf16.vlgmr.msra.gmra.mrb[0].mxu0 %vm190_vm9, %v4496_v23 }
  0xfd   : > { %3503 = vmatpush3.bf16.msra.mxu0 %v3871_v53  ;;  %3474 = vmatprep.mubr.msk.bf16.mxu0 %vm190_vm9, %v4506_v44 }
  0xfe   : > { %3504 = vmatprep.subr.bf16.mxu0 %v3872_v26 }
 0x101   : > { %3505 = vmatpush3.bf16.msra.mxu0 %v3872_v26 }
 0x102   : > { %3506 = vmatprep.subr.bf16.mxu0 %v3873_v21 }
 0x104   : > { %3475 = vmatmul.mubr.msk.bf16.gmra.mrb[4].mxu0 %vm190_vm9, %v4513_v4 }
 0x105   : > { %3478 = vmatprep.mubr.msk.bf16.mxu0 %vm190_vm9, %v4523_v31  ;;  %3507 = vmatpush3.bf16.msra.mxu0 %v3873_v21 }
 0x106   : > { %3508 = vmatprep.subr.bf16.mxu0 %v3874_v27 }
 0x109   : > { %3509 = vmatpush3.bf16.msra.mxu0 %v3874_v27 }
 0x10a   : > { %3510 = vmatprep.subr.bf16.mxu0 %v3875_v28 }
 0x10c   : > { %3479 = vmatmul.mubr.msk.bf16.gmra.mrb[8].mxu0 %vm190_vm9, %v4533_v38 }
 0x10d   : > { %3482 = vmatprep.mubr.msk.bf16.mxu0 %vm190_vm9, %v4543_v43  ;;  %3511 = vmatpush3.bf16.msra.mxu0 %v3875_v28 }
 0x10e   : > { %3512 = vmatprep.subr.bf16.mxu0 %v3876_v30 }
 0x111   : > { %3513 = vmatpush3.bf16.msra.mxu0 %v3876_v30 }
 0x114   : > { %3483 = vmatmul.mubr.msk.bf16.gmra.mrb[12].mxu0 %vm190_vm9, %v4553_v50 }
 0x115   : > { %3486 = vmatprep.mubr.msk.bf16.mxu0 %vm190_vm9, %v4563_v1 }
 0x11c   : > { %3487 = vmatmul.mubr.msk.bf16.gmra.mrb[16].mxu0 %vm190_vm9, %v4570_v61 }
 0x11d   : > { %3490 = vmatprep.mubr.msk.bf16.mxu0 %vm190_vm9, %v4577_v60 }
 0x124   : > { %3491 = vmatmul.mubr.msk.bf16.gmra.mrb[20].mxu0 %vm190_vm9, %v4584_v6 }
 0x125   : > { %3494 = vmatprep.mubr.msk.bf16.mxu0 %vm190_vm9, %v4591_v9 }
 0x12c   : > { %3495 = vmatmul.mubr.msk.bf16.gmra.mrb[24].mxu0 %vm190_vm9, %v4598_v11 }
 0x12d   : > { %3498 = vmatprep.mubr.msk.bf16.mxu0 %vm190_vm9, %v4605_v12 }
 0x134   : > { %3499 = vmatmul.mubr.msk.bf16.gmra.mrb[28].mxu0 %vm190_vm9, %v4609_v19 }
 0x135   : > { %3514 = vmatprep.mubr.msk.bf16.mxu0 %vm190_vm9, %v4506_v44 }
 0x13c   : > { %3515 = vmatmul.mubr.msk.bf16.vlgmr.msra.gmra.mrb[0].mxu0 %vm190_vm9, %v4513_v4 }
 0x13d   : > { %3518 = vmatprep.mubr.msk.bf16.mxu0 %vm190_vm9, %v4523_v31 }
 0x144   : > { %3519 = vmatmul.mubr.msk.bf16.gmra.mrb[4].mxu0 %vm190_vm9, %v4533_v38 }
 0x145   : > { %3522 = vmatprep.mubr.msk.bf16.mxu0 %vm190_vm9, %v4543_v43 }
 0x14c   : > { %3523 = vmatmul.mubr.msk.bf16.gmra.mrb[8].mxu0 %vm190_vm9, %v4553_v50 }
 0x14d   : > { %3526 = vmatprep.mubr.msk.bf16.mxu0 %vm190_vm9, %v4563_v1 }
 0x154   : > { %3527 = vmatmul.mubr.msk.bf16.gmra.mrb[12].mxu0 %vm190_vm9, %v4570_v61 }
 0x155   : > { %3530 = vmatprep.mubr.msk.bf16.mxu0 %vm190_vm9, %v4577_v60 }
 0x15c   : > { %3531 = vmatmul.mubr.msk.bf16.gmra.mrb[16].mxu0 %vm190_vm9, %v4584_v6 }
 0x15d   : > { %3534 = vmatprep.mubr.msk.bf16.mxu0 %vm190_vm9, %v4591_v9 }
 0x164   : > { %3535 = vmatmul.mubr.msk.bf16.gmra.mrb[20].mxu0 %vm190_vm9, %v4598_v11 }
 0x165   : > { %3538 = vmatprep.mubr.msk.bf16.mxu0 %vm190_vm9, %v4605_v12 }
 0x16c   : > { %3539 = vmatmul.mubr.msk.bf16.gmra.mrb[24].mxu0 %vm190_vm9, %v4609_v19 }
 0x16d   : > { %3542 = vmatprep.mubr.msk.bf16.mxu0 %vm190_vm9, %v4617_v25 }
 0x174   : > { %3543 = vmatmul.mubr.msk.bf16.gmra.mrb[28].mxu0 %vm190_vm9, %v1298_v37 }
 0x20f   : > { %v3516_v40 = vpop.f32.mrb[0].mxu0 }
 0x210   : > { %v1597_v41 = vadd.f32 %v3516_v40, %v4713_v36  ;;  %v1429_v42 = vpop.f32.mrb[1].mxu0 }
 0x211   : > { %v1595_v45 = vadd.f32 %v4713_v36, %v1429_v42  ;;  %v3517_v47 = vpop.f32.mrb[2].mxu0 }
 0x212   : > { %v1598_v49 = vadd.f32 %v3517_v47, %v4713_v36  ;;  %v1432_v51 = vpop.f32.mrb[3].mxu0  ;;  %v1629_v53 = vmax.f32 %v1597_v41, 0.0 }
 0x213   : > { %v1596_v52 = vadd.f32 %v4713_v36, %v1432_v51  ;;  %v1627_v54 = vmax.f32 %v1595_v45, 0.0 }
 0x214   : > { %v1630_v0 = vmax.f32 %v1598_v49, 0.0 }
 0x215   : > { %v1628_v56 = vmax.f32 %v1596_v52, 0.0 }
 0x216   : > { %v1660_v57 = vpack.c.bf16 %v1630_v0, %v1629_v53 }
 0x217   : > { %v1659_v59 = vpack.c.bf16 %v1628_v56, %v1627_v54  ;;  %v3520_v13 = vpop.f32.mrb[4].mxu0 }
 0x218   : > { %v1686_v55 = vshll.u32 %v1660_v57, 16  ;;  %v1601_v63 = vadd.f32 %v3520_v13, %v4713_v36  ;;  %1868 = vrot.lane.b32.xlu1 %v1660_v57, %s4028_s23  ;;  %v1445_v3 = vpop.f32.mrb[5].mxu0  ;;  %v1683_v5 = vshrl.u32 %v1660_v57, 16 }
 0x219   : > { %v1679_v15 = vshll.u32 %v1659_v59, 16  ;;  %v1599_v7 = vadd.f32 %v4713_v36, %v1445_v3  ;;  %1866 = vrot.lane.b32.xlu0 %v1659_v59, %s4028_s23  ;;  %v3521_v8 = vpop.f32.mrb[6].mxu0  ;;  %v1676_v10 = vshrl.u32 %v1659_v59, 16 }
 0x21a   : > { %v1602_v32 = vadd.f32 %v3521_v8, %v4713_v36  ;;  %v1448_v14 = vpop.f32.mrb[7].mxu0  ;;  %v1685_v48 = vrot.slane %v1683_v5, 7  ;;  %v1633_v18 = vmax.f32 %v1601_v63, 0.0  ;;  %v1932_v22 = vrot.slane %v1686_v55, 1 }
 0x21b   : > { %v1600_v2 = vadd.f32 %v4713_v36, %v1448_v14  ;;  %v1930_v62 = vrot.slane %v1679_v15, 1  ;;  %v1678_v16 = vrot.slane %v1676_v10, 7  ;;  %v1631_v26 = vmax.f32 %v1599_v7, 0.0 }
 0x21c   : > { %v1634_v20 = vmax.f32 %v1602_v32, 0.0  ;;  %v1688_v24 = vor.u32 %v1686_v55, %v1685_v48  ;;  %v1933_v47 = vor.u32 %v1932_v22, %v1683_v5 }
 0x21d   : > { %v1632_v21 = vmax.f32 %v1600_v2, 0.0  ;;  %v1931_v27 = vor.u32 %v1930_v62, %v1676_v10  ;;  %v1681_v28 = vor.u32 %v1679_v15, %v1678_v16 }
 0x21e   : > { %v1662_v30 = vpack.c.bf16 %v1634_v20, %v1633_v18  ;;  %v1806_v37 = vsel %vm4213_vm8, %v1688_v24, %v4506_v44 }
 0x21f   : > { %v1661_v58 = vpack.c.bf16 %v1632_v21, %v1631_v26  ;;  %1962 = vrot.lane.b32.xlu1 %v1931_v27, %s4029_s4  ;;  %v1803_v33 = vsel %vm4213_vm8, %v1681_v28, %v4496_v23  ;;  %v3524_v34 = vpop.f32.mrb[8].mxu0  ;;  %1807 = vst [vmem:[#allocation2 + $0x10] sm:$0xff] %v1806_v37  ;;  %v4744_v23 = vld [vmem:[%s5239_s1] sm:$0xff]  }
 0x220   : > { %v1700_v35 = vshll.u32 %v1662_v30, 16  ;;  %1804 = vst [vmem:[#allocation2 + $0x8] sm:$0xff] %v1803_v33  ;;  %v1605_v39 = vadd.f32 %v3524_v34, %v4713_v36  ;;  %v1461_v40 = vpop.f32.mrb[9].mxu0  ;;  %v1697_v41 = vshrl.u32 %v1662_v30, 16  ;;  %3590 = vmatprep.subr.bf16.mxu1 %v4744_v23 }
 0x221   : > { %v1693_v42 = vshll.u32 %v1661_v58, 16  ;;  %v1603_v45 = vadd.f32 %v4713_v36, %v1461_v40  ;;  %1870 = vrot.lane.b32.xlu0 %v1661_v58, %s4028_s23  ;;  %v3525_v44 = vpop.f32.mrb[10].mxu0  ;;  %v1690_v29 = vshrl.u32 %v1661_v58, 16 }
 0x222   : > { %v1606_v49 = vadd.f32 %v3525_v44, %v4713_v36  ;;  %v1464_v51 = vpop.f32.mrb[11].mxu0  ;;  %v1699_v52 = vrot.slane %v1697_v41, 7  ;;  %v1637_v56 = vmax.f32 %v1605_v39, 0.0  ;;  %v1936_v13 = vrot.slane %v1700_v35, 1 }
 0x223   : > { %v1604_v53 = vadd.f32 %v4713_v36, %v1464_v51  ;;  %1964 = vrot.lane.b32.xlu1 %v1933_v47, %s4029_s4  ;;  %v1934_v0 = vrot.slane %v1693_v42, 1  ;;  %v1692_v54 = vrot.slane %v1690_v29, 7  ;;  %v1635_v55 = vmax.f32 %v1603_v45, 0.0 }
 0x224   : > { %v1638_v57 = vmax.f32 %v1606_v49, 0.0  ;;  %v1702_v59 = vor.u32 %v1700_v35, %v1699_v52  ;;  %v1937_v20 = vor.u32 %v1936_v13, %v1697_v41 }
 0x225   : > { %v1636_v63 = vmax.f32 %v1604_v53, 0.0  ;;  %1872 = vrot.lane.b32.xlu0 %v1662_v30, %s4028_s23  ;;  %v1935_v3 = vor.u32 %v1934_v0, %v1690_v29  ;;  %v1695_v5 = vor.u32 %v1693_v42, %v1692_v54 }
 0x226   : > { %v1664_v15 = vpack.c.bf16 %v1638_v57, %v1637_v56  ;;  %v1812_v7 = vsel %vm4213_vm8, %v1702_v59, %v4523_v31 }
 0x227   : > { %v1663_v8 = vpack.c.bf16 %v1636_v63, %v1635_v55  ;;  %1966 = vrot.lane.b32.xlu1 %v1935_v3, %s4029_s4  ;;  %v1809_v10 = vsel %vm4213_vm8, %v1695_v5, %v4513_v4  ;;  %v3528_v32 = vpop.f32.mrb[12].mxu0  ;;  %1813 = vst [vmem:[#allocation2 + $0x20] sm:$0xff] %v1812_v7 }
 0x228   : > { %v1714_v14 = vshll.u32 %v1664_v15, 16  ;;  %1810 = vst [vmem:[#allocation2 + $0x18] sm:$0xff] %v1809_v10  ;;  %v1609_v48 = vadd.f32 %v3528_v32, %v4713_v36  ;;  %v1477_v2 = vpop.f32.mrb[13].mxu0  ;;  %v1711_v62 = vshrl.u32 %v1664_v15, 16 }
 0x229   : > { %v1707_v16 = vshll.u32 %v1663_v8, 16  ;;  %v1607_v18 = vadd.f32 %v4713_v36, %v1477_v2  ;;  %1874 = vrot.lane.b32.xlu0 %v1663_v8, %s4028_s23  ;;  %v3529_v31 = vpop.f32.mrb[14].mxu0  ;;  %v1704_v24 = vshrl.u32 %v1663_v8, 16 }
 0x22a   : > { %v1610_v22 = vadd.f32 %v3529_v31, %v4713_v36  ;;  %v1480_v26 = vpop.f32.mrb[15].mxu0  ;;  %v1713_v4 = vrot.slane %v1711_v62, 7  ;;  %v1641_v30 = vmax.f32 %v1609_v48, 0.0  ;;  %v1940_v33 = vrot.slane %v1714_v14, 1 }
 0x22b   : > { %v1608_v21 = vadd.f32 %v4713_v36, %v1480_v26  ;;  %1968 = vrot.lane.b32.xlu1 %v1937_v20, %s4029_s4  ;;  %v1938_v27 = vrot.slane %v1707_v16, 1  ;;  %v1706_v28 = vrot.slane %v1704_v24, 7  ;;  %v1639_v34 = vmax.f32 %v1607_v18, 0.0 }
 0x22c   : > { %v1642_v37 = vmax.f32 %v1610_v22, 0.0  ;;  %v1716_v58 = vor.u32 %v1714_v14, %v1713_v4  ;;  %v1941_v54 = vor.u32 %v1940_v33, %v1711_v62 }
 0x22d   : > { %v1640_v35 = vmax.f32 %v1608_v21, 0.0  ;;  %1876 = vrot.lane.b32.xlu0 %v1664_v15, %s4028_s23  ;;  %v1939_v39 = vor.u32 %v1938_v27, %v1704_v24  ;;  %v1709_v40 = vor.u32 %v1707_v16, %v1706_v28 }
 0x22e   : > { %v1666_v41 = vpack.c.bf16 %v1642_v37, %v1641_v30  ;;  %v1818_v42 = vsel %vm4213_vm8, %v1716_v58, %v4543_v43 }
 0x22f   : > { %v1665_v45 = vpack.c.bf16 %v1640_v35, %v1639_v34  ;;  %1970 = vrot.lane.b32.xlu1 %v1939_v39, %s4029_s4  ;;  %v1815_v44 = vsel %vm4213_vm8, %v1709_v40, %v4533_v38  ;;  %v3532_v47 = vpop.f32.mrb[16].mxu0  ;;  %1819 = vst [vmem:[#allocation2 + $0x30] sm:$0xff] %v1818_v42 }
 0x230   : > { %v1728_v29 = vshll.u32 %v1666_v41, 16  ;;  %1816 = vst [vmem:[#allocation2 + $0x28] sm:$0xff] %v1815_v44  ;;  %v1613_v49 = vadd.f32 %v3532_v47, %v4713_v36  ;;  %v1493_v51 = vpop.f32.mrb[17].mxu0  ;;  %v1725_v52 = vshrl.u32 %v1666_v41, 16 }
 0x231   : > { %v1721_v53 = vshll.u32 %v1665_v45, 16  ;;  %v1611_v0 = vadd.f32 %v4713_v36, %v1493_v51  ;;  %1878 = vrot.lane.b32.xlu0 %v1665_v45, %s4028_s23  ;;  %v3533_v43 = vpop.f32.mrb[18].mxu0  ;;  %v1718_v56 = vshrl.u32 %v1665_v45, 16 }
 0x232   : > { %v1614_v57 = vadd.f32 %v3533_v43, %v4713_v36  ;;  %v1496_v59 = vpop.f32.mrb[19].mxu0  ;;  %v1727_v38 = vrot.slane %v1725_v52, 7  ;;  %v1645_v3 = vmax.f32 %v1613_v49, 0.0  ;;  %v1944_v7 = vrot.slane %v1728_v29, 1 }
 0x233   : > { %v1612_v13 = vadd.f32 %v4713_v36, %v1496_v59  ;;  %1972 = vrot.lane.b32.xlu1 %v1941_v54, %s4029_s4  ;;  %v1942_v55 = vrot.slane %v1721_v53, 1  ;;  %v1720_v63 = vrot.slane %v1718_v56, 7  ;;  %v1643_v8 = vmax.f32 %v1611_v0, 0.0 }
 0x234   : > { %v1646_v5 = vmax.f32 %v1614_v57, 0.0  ;;  %v1730_v15 = vor.u32 %v1728_v29, %v1727_v38  ;;  %v1945_v21 = vor.u32 %v1944_v7, %v1725_v52 }
 0x235   : > { %v1644_v10 = vmax.f32 %v1612_v13, 0.0  ;;  %1880 = vrot.lane.b32.xlu0 %v1666_v41, %s4028_s23  ;;  %v1943_v32 = vor.u32 %v1942_v55, %v1718_v56  ;;  %v1723_v14 = vor.u32 %v1721_v53, %v1720_v63 }
 0x236   : > { %v1668_v48 = vpack.c.bf16 %v1646_v5, %v1645_v3  ;;  %v1824_v2 = vsel %vm4213_vm8, %v1730_v15, %v4563_v1 }
 0x237   : > { %v1667_v62 = vpack.c.bf16 %v1644_v10, %v1643_v8  ;;  %1974 = vrot.lane.b32.xlu1 %v1943_v32, %s4029_s4  ;;  %v1821_v16 = vsel %vm4213_vm8, %v1723_v14, %v4553_v50  ;;  %v3536_v18 = vpop.f32.mrb[20].mxu0  ;;  %1825 = vst [vmem:[#allocation2 + $0x40] sm:$0xff] %v1824_v2 }
 0x238   : > { %v1742_v31 = vshll.u32 %v1668_v48, 16  ;;  %1822 = vst [vmem:[#allocation2 + $0x38] sm:$0xff] %v1821_v16  ;;  %v1617_v20 = vadd.f32 %v3536_v18, %v4713_v36  ;;  %v1509_v24 = vpop.f32.mrb[21].mxu0  ;;  %v1739_v22 = vshrl.u32 %v1668_v48, 16 }
 0x239   : > { %v1735_v26 = vshll.u32 %v1667_v62, 16  ;;  %v1615_v4 = vadd.f32 %v4713_v36, %v1509_v24  ;;  %1882 = vrot.lane.b32.xlu0 %v1667_v62, %s4028_s23  ;;  %v3537_v1 = vpop.f32.mrb[22].mxu0  ;;  %v1732_v27 = vshrl.u32 %v1667_v62, 16 }
 0x23a   : > { %v1618_v28 = vadd.f32 %v3537_v1, %v4713_v36  ;;  %v1512_v30 = vpop.f32.mrb[23].mxu0  ;;  %v1741_v50 = vrot.slane %v1739_v22, 7  ;;  %v1649_v34 = vmax.f32 %v1617_v20, 0.0  ;;  %v1948_v40 = vrot.slane %v1742_v31, 1 }
 0x23b   : > { %v1616_v37 = vadd.f32 %v4713_v36, %v1512_v30  ;;  %1976 = vrot.lane.b32.xlu1 %v1945_v21, %s4029_s4  ;;  %v1946_v58 = vrot.slane %v1735_v26, 1  ;;  %v1734_v33 = vrot.slane %v1732_v27, 7  ;;  %v1647_v41 = vmax.f32 %v1615_v4, 0.0 }
 0x23c   : > { %v1650_v35 = vmax.f32 %v1618_v28, 0.0  ;;  %v1744_v39 = vor.u32 %v1742_v31, %v1741_v50  ;;  %v1949_v59 = vor.u32 %v1948_v40, %v1739_v22 }
 0x23d   : > { %v1648_v42 = vmax.f32 %v1616_v37, 0.0  ;;  %1884 = vrot.lane.b32.xlu0 %v1668_v48, %s4028_s23  ;;  %v1947_v45 = vor.u32 %v1946_v58, %v1732_v27  ;;  %v1737_v44 = vor.u32 %v1735_v26, %v1734_v33 }
 0x23e   : > { %v1670_v47 = vpack.c.bf16 %v1650_v35, %v1649_v34  ;;  %v1830_v29 = vsel %vm4213_vm8, %v1744_v39, %v4577_v60 }
 0x23f   : > { %v1669_v49 = vpack.c.bf16 %v1648_v42, %v1647_v41  ;;  %1978 = vrot.lane.b32.xlu1 %v1947_v45, %s4029_s4  ;;  %v1827_v51 = vsel %vm4213_vm8, %v1737_v44, %v4570_v61  ;;  %v3540_v52 = vpop.f32.mrb[24].mxu0  ;;  %1831 = vst [vmem:[#allocation2 + $0x50] sm:$0xff] %v1830_v29 }
 0x240   : > { %v1756_v53 = vshll.u32 %v1670_v47, 16  ;;  %1828 = vst [vmem:[#allocation2 + $0x48] sm:$0xff] %v1827_v51  ;;  %v1621_v0 = vadd.f32 %v3540_v52, %v4713_v36  ;;  %v1525_v43 = vpop.f32.mrb[25].mxu0  ;;  %v1753_v54 = vshrl.u32 %v1670_v47, 16 }
 0x241   : > { %v1749_v56 = vshll.u32 %v1669_v49, 16  ;;  %v1619_v57 = vadd.f32 %v4713_v36, %v1525_v43  ;;  %1886 = vrot.lane.b32.xlu0 %v1669_v49, %s4028_s23  ;;  %v3541_v60 = vpop.f32.mrb[26].mxu0  ;;  %v1746_v38 = vshrl.u32 %v1669_v49, 16 }
 0x242   : > { %v1622_v13 = vadd.f32 %v3541_v60, %v4713_v36  ;;  %v1528_v55 = vpop.f32.mrb[27].mxu0  ;;  %v1755_v61 = vrot.slane %v1753_v54, 7  ;;  %v1653_v15 = vmax.f32 %v1621_v0, 0.0  ;;  %v1952_v10 = vrot.slane %v1756_v53, 1 }
 0x243   : > { %v1620_v63 = vadd.f32 %v4713_v36, %v1528_v55  ;;  %1980 = vrot.lane.b32.xlu1 %v1949_v59, %s4029_s4  ;;  %v1950_v3 = vrot.slane %v1749_v56, 1  ;;  %v1748_v5 = vrot.slane %v1746_v38, 7  ;;  %v1651_v32 = vmax.f32 %v1619_v57, 0.0 }
 0x244   : > { %v1654_v7 = vmax.f32 %v1622_v13, 0.0  ;;  %v1758_v8 = vor.u32 %v1756_v53, %v1755_v61  ;;  %v1953_v27 = vor.u32 %v1952_v10, %v1753_v54 }
 0x245   : > { %v1652_v14 = vmax.f32 %v1620_v63, 0.0  ;;  %1888 = vrot.lane.b32.xlu0 %v1670_v47, %s4028_s23  ;;  %v1951_v48 = vor.u32 %v1950_v3, %v1746_v38  ;;  %v1751_v2 = vor.u32 %v1749_v56, %v1748_v5 }
 0x246   : > { %v1672_v62 = vpack.c.bf16 %v1654_v7, %v1653_v15  ;;  %v1836_v16 = vsel %vm4213_vm8, %v1758_v8, %v4591_v9  ;;  %v3884_v7 = vld [vmem:[%s5239_s1 + $0x8] sm:$0xff]  }
 0x247   : > { %v1671_v18 = vpack.c.bf16 %v1652_v14, %v1651_v32  ;;  %1982 = vrot.lane.b32.xlu1 %v1951_v48, %s4029_s4  ;;  %v1833_v31 = vsel %vm4213_vm8, %v1751_v2, %v4584_v6  ;;  %v3544_v20 = vpop.f32.mrb[28].mxu0  ;;  %1837 = vst [vmem:[#allocation2 + $0x60] sm:$0xff] %v1836_v16  ;;  %v3885_v14 = vld [vmem:[%s5239_s1 + $0x10] sm:$0xff]  }
 0x248   : > { %v1770_v24 = vshll.u32 %v1672_v62, 16  ;;  %1834 = vst [vmem:[#allocation2 + $0x58] sm:$0xff] %v1833_v31  ;;  %v1625_v22 = vadd.f32 %v3544_v20, %v4713_v36  ;;  %v1541_v26 = vpop.f32.mrb[29].mxu0  ;;  %v1767_v4 = vshrl.u32 %v1672_v62, 16 }
 0x249   : > { %v1763_v1 = vshll.u32 %v1671_v18, 16  ;;  %v1623_v21 = vadd.f32 %v4713_v36, %v1541_v26  ;;  %1890 = vrot.lane.b32.xlu0 %v1671_v18, %s4028_s23  ;;  %v3545_v9 = vpop.f32.mrb[30].mxu0  ;;  %v1760_v28 = vshrl.u32 %v1671_v18, 16 }
 0x24a   : > { %v1626_v30 = vadd.f32 %v3545_v9, %v4713_v36  ;;  %v1544_v50 = vpop.f32.mrb[31].mxu0  ;;  %v1769_v6 = vrot.slane %v1767_v4, 7  ;;  %v1657_v34 = vmax.f32 %v1625_v22, 0.0  ;;  %v1956_v40 = vrot.slane %v1770_v24, 1  ;;  %v3887_v22 = vld [vmem:[%s5239_s1 + $0x20] sm:$0xff]   ;;  %v3888_v9 = vld [vmem:[%s5239_s1 + $0x28] sm:$0xff]  }
 0x24b   : > { %v1624_v37 = vadd.f32 %v4713_v36, %v1544_v50  ;;  %1984 = vrot.lane.b32.xlu1 %v1953_v27, %s4029_s4  ;;  %v1954_v58 = vrot.slane %v1763_v1, 1  ;;  %v1762_v33 = vrot.slane %v1760_v28, 7  ;;  %v1655_v41 = vmax.f32 %v1623_v21, 0.0 }
 0x24c   : > { %v1658_v35 = vmax.f32 %v1626_v30, 0.0  ;;  %v1772_v39 = vor.u32 %v1770_v24, %v1769_v6  ;;  %v1957_v0 = vor.u32 %v1956_v40, %v1767_v4  ;;  %v4908_v6 = vld [vmem:[%s5239_s1 + $0x60] sm:$0xff]  }
 0x24d   : > { %v1656_v42 = vmax.f32 %v1624_v37, 0.0  ;;  %1892 = vrot.lane.b32.xlu0 %v1672_v62, %s4028_s23  ;;  %v1955_v45 = vor.u32 %v1954_v58, %v1760_v28  ;;  %v1765_v44 = vor.u32 %v1763_v1, %v1762_v33 }
 0x24e   : > { %v1674_v47 = vpack.c.bf16 %v1658_v35, %v1657_v34  ;;  %v1842_v29 = vsel %vm4213_vm8, %v1772_v39, %v4605_v12 }
 0x24f   : > { %v1673_v36 = vpack.c.bf16 %v1656_v42, %v1655_v41  ;;  %1986 = vrot.lane.b32.xlu1 %v1955_v45, %s4029_s4  ;;  %v1839_v49 = vsel %vm4213_vm8, %v1765_v44, %v4598_v11  ;;  %1843 = vst [vmem:[#allocation2 + $0x70] sm:$0xff] %v1842_v29 }
 0x250   : > { %v1784_v51 = vshll.u32 %v1674_v47, 16  ;;  %1840 = vst [vmem:[#allocation2 + $0x68] sm:$0xff] %v1839_v49  ;;  %v1781_v52 = vshrl.u32 %v1674_v47, 16 }
 0x251   : > { %v1777_v53 = vshll.u32 %v1673_v36, 16  ;;  %1894 = vrot.lane.b32.xlu0 %v1673_v36, %s4028_s23  ;;  %v1774_v43 = vshrl.u32 %v1673_v36, 16 }
 0x252   : > { %v1960_v54 = vrot.slane %v1784_v51, 1  ;;  %v1783_v56 = vrot.slane %v1781_v52, 7 }
 0x253   : > { %1988 = vrot.lane.b32.xlu1 %v1957_v0, %s4029_s4  ;;  %v1958_v12 = vrot.slane %v1777_v53, 1  ;;  %v1776_v57 = vrot.slane %v1774_v43, 7 }
 0x254   : > { %v1961_v60 = vor.u32 %v1960_v54, %v1781_v52  ;;  %v1786_v59 = vor.u32 %v1784_v51, %v1783_v56 }
 0x255   : > { %1896 = vrot.lane.b32.xlu0 %v1674_v47, %s4028_s23  ;;  %v1779_v11 = vor.u32 %v1777_v53, %v1776_v57  ;;  %v1959_v13 = vor.u32 %v1958_v12, %v1774_v43  ;;  %s4031_s23 = smov [#allocation6]  }
 0x256   : > { %v1848_v38 = vsel %vm4213_vm8, %v1786_v59, %v4617_v25 }
 0x257   : > { %1992 = vrot.lane.b32.xlu1 %v1961_v60, %s4029_s4  ;;  %1849 = vst [vmem:[#allocation2 + $0x80] sm:$0xff] %v1848_v38  ;;  %v1845_v55 = vsel %vm4213_vm8, %v1779_v11, %v4609_v19 }
 0x258   : > { %1846 = vst [vmem:[#allocation2 + $0x78] sm:$0xff] %v1845_v55 }
 0x259   : > { %1990 = vrot.lane.b32.xlu0 %v1959_v13, %s4029_s4  ;;  %s3961_s4 = sshll.u32 %s4031_s23, 4  ;;  %s3962_s4 = int_to_ptr.vmem [resolvable:$false] %s3961_s4 }
 0x25a   : > { %s3963_s6 = scalar_lea.vmem %s3962_s4, 8192  ;;  %p3964_p8 = scmp.lt.s32.totalorder %s5187_s27, %s3962_s4 }
 0x25b   : > { %p3965_p10 = scmp.lt.s32.totalorder %s3963_s6, %s3957_s10 }
 0x25d   : > { %p3966_p0 = por %p3965_p10, %p3964_p8 }
 0x25f   : > { %p3967_p2 = pnand %p3966_p0, %p3960_p13 }
 0x28a   : > { %v1869_v61 = vpop.permute.xlu1 %1868 }
 0x28b   : > { %1915 = vst.msk [vmem:[#allocation2 + $0x10] sm:$0xff] %vm588_vm10, %v1869_v61  ;;  %v1867_v63 = vpop.permute.xlu0 %1866 }
 0x28c   : > { %1914 = vst.msk [vmem:[#allocation2 + $0x8] sm:$0xff] %vm588_vm10, %v1867_v63 }
 0x291   : > { %v1963_v3 = vpop.permute.xlu1 %1962 }
 0x292   : > { %v2013_v46 = vld [vmem:[#allocation2 + $0x10] sm:$0xff] }
 0x293   : > { %v2010_v5 = vld [vmem:[#allocation2 + $0x8] sm:$0xff]  ;;  %v1871_v25 = vpop.permute.xlu0 %1870 }
 0x294   : > { %v4843_v15 = vsel %vm4490_vm13, %v1963_v3, %v2010_v5  ;;  %1916 = vst.msk [vmem:[#allocation2 + $0x18] sm:$0xff] %vm588_vm10, %v1871_v25 }
 0x295   : > { %2012 = vst [vmem:[#allocation2 + $0x8] sm:$0xff] %v4843_v15  ;;  %v1965_v19 = vpop.permute.xlu1 %1964  ;;  %3558 = vmatprep.mubr.msk.bf16.mxu1 %vm190_vm9, %v4843_v15 }
 0x296   : > { %v4854_v8 = vsel %vm4490_vm13, %v1965_v19, %v2013_v46  ;;  %v2058_v19 = vld [vmem:[#allocation2] sm:$0xff] }
 0x297   : > { %2015 = vst [vmem:[#allocation2 + $0x10] sm:$0xff] %v4854_v8  ;;  %v1873_v10 = vpop.permute.xlu0 %1872  ;;  %3559 = vmatmul.mubr.msk.bf16.vlgmr.msra.gmra.mrb[0].mxu1 %vm190_vm9, %v4854_v8 }
 0x298   : > { %1917 = vst.msk [vmem:[#allocation2 + $0x20] sm:$0xff] %vm588_vm10, %v1873_v10  ;;  %3591 = vmatpush3.bf16.msra.mxu1 %v4744_v23  ;;  %v3886_v23 = vld [vmem:[%s5239_s1 + $0x18] sm:$0xff]   ;;  %v3890_v10 = vld [vmem:[%s5239_s1 + $0x68] sm:$0xff]  }
 0x299   : > { %v1967_v32 = vpop.permute.xlu1 %1966  ;;  %3592 = vmatprep.subr.bf16.mxu1 %v3884_v7 }
 0x29b   : > { %v2016_v48 = vld [vmem:[#allocation2 + $0x18] sm:$0xff]  ;;  %v1875_v2 = vpop.permute.xlu0 %1874 }
 0x29c   : > { %v4866_v62 = vsel %vm4490_vm13, %v1967_v32, %v2016_v48  ;;  %1918 = vst.msk [vmem:[#allocation2 + $0x28] sm:$0xff] %vm588_vm10, %v1875_v2  ;;  %3593 = vmatpush3.bf16.msra.mxu1 %v3884_v7  ;;  %v3892_v32 = vld [vmem:[%s5239_s1 + $0x78] sm:$0xff]   ;;  %v5053_v48 = vld [vmem:[%s5240_s2] ss:$0 sm:$0xff] }
 0x29d   : > { %2018 = vst [vmem:[#allocation2 + $0x18] sm:$0xff] %v4866_v62  ;;  %v1969_v16 = vpop.permute.xlu1 %1968  ;;  %3562 = vmatprep.mubr.msk.bf16.mxu1 %vm190_vm9, %v4866_v62  ;;  %3594 = vmatprep.subr.bf16.mxu1 %v3885_v14 }
 0x29f   : > { %v2019_v18 = vld [vmem:[#allocation2 + $0x20] sm:$0xff]  ;;  %v1877_v31 = vpop.permute.xlu0 %1876 }
 0x2a0   : > { %v4877_v20 = vsel %vm4490_vm13, %v1969_v16, %v2019_v18  ;;  %1919 = vst.msk [vmem:[#allocation2 + $0x30] sm:$0xff] %vm588_vm10, %v1877_v31  ;;  %3595 = vmatpush3.bf16.msra.mxu1 %v3885_v14  ;;  %v3894_v14 = vld [vmem:[%s5239_s1 + $0x88] sm:$0xff]  }
 0x2a1   : > { %2021 = vst [vmem:[#allocation2 + $0x20] sm:$0xff] %v4877_v20  ;;  %v1971_v24 = vpop.permute.xlu1 %1970  ;;  %3563 = vmatmul.mubr.msk.bf16.gmra.mrb[4].mxu1 %vm190_vm9, %v4877_v20  ;;  %3596 = vmatprep.subr.bf16.mxu1 %v3886_v23 }
 0x2a3   : > { %v2022_v26 = vld [vmem:[#allocation2 + $0x28] sm:$0xff]  ;;  %v1879_v4 = vpop.permute.xlu0 %1878 }
 0x2a4   : > { %v4888_v1 = vsel %vm4490_vm13, %v1971_v24, %v2022_v26  ;;  %1920 = vst.msk [vmem:[#allocation2 + $0x38] sm:$0xff] %vm588_vm10, %v1879_v4  ;;  %3597 = vmatpush3.bf16.msra.mxu1 %v3886_v23  ;;  %v3895_v4 = vld [vmem:[%s4164_s11 + $0x10] sm:$0xff] }
 0x2a5   : > { %2024 = vst [vmem:[#allocation2 + $0x28] sm:$0xff] %v4888_v1  ;;  %v1973_v21 = vpop.permute.xlu1 %1972  ;;  %3566 = vmatprep.mubr.msk.bf16.mxu1 %vm190_vm9, %v4888_v1  ;;  %3598 = vmatprep.subr.bf16.mxu1 %v3887_v22 }
 0x2a7   : > { %v2025_v27 = vld [vmem:[#allocation2 + $0x30] sm:$0xff]  ;;  %v1881_v28 = vpop.permute.xlu0 %1880 }
 0x2a8   : > { %v4899_v30 = vsel %vm4490_vm13, %v1973_v21, %v2025_v27  ;;  %1921 = vst.msk [vmem:[#allocation2 + $0x40] sm:$0xff] %vm588_vm10, %v1881_v28  ;;  %3599 = vmatpush3.bf16.msra.mxu1 %v3887_v22 }
 0x2a9   : > { %2027 = vst [vmem:[#allocation2 + $0x30] sm:$0xff] %v4899_v30  ;;  %v1975_v50 = vpop.permute.xlu1 %1974  ;;  %3567 = vmatmul.mubr.msk.bf16.gmra.mrb[8].mxu1 %vm190_vm9, %v4899_v30  ;;  %3600 = vmatprep.subr.bf16.mxu1 %v3888_v9 }
 0x2ab   : > { %v2028_v37 = vld [vmem:[#allocation2 + $0x38] sm:$0xff]  ;;  %v1883_v58 = vpop.permute.xlu0 %1882 }
 0x2ac   : > { %v4912_v33 = vsel %vm4490_vm13, %v1975_v50, %v2028_v37  ;;  %1922 = vst.msk [vmem:[#allocation2 + $0x48] sm:$0xff] %vm588_vm10, %v1883_v58  ;;  %3601 = vmatpush3.bf16.msra.mxu1 %v3888_v9  ;;  %v3896_v9 = vld [vmem:[%s4164_s11] sm:$0xff] }
 0x2ad   : > { %2030 = vst [vmem:[#allocation2 + $0x38] sm:$0xff] %v4912_v33  ;;  %v1977_v34 = vpop.permute.xlu1 %1976  ;;  %3570 = vmatprep.mubr.msk.bf16.mxu1 %vm190_vm9, %v4912_v33  ;;  %3634 = vmatprep.subr.bf16.mxu1 %v4908_v6 }
 0x2af   : > { %v2031_v35 = vld [vmem:[#allocation2 + $0x40] sm:$0xff]  ;;  %v1885_v39 = vpop.permute.xlu0 %1884 }
 0x2b0   : > { %v4921_v40 = vsel %vm4490_vm13, %v1977_v34, %v2031_v35  ;;  %1923 = vst.msk [vmem:[#allocation2 + $0x50] sm:$0xff] %vm588_vm10, %v1885_v39 }
 0x2b1   : > { %2033 = vst [vmem:[#allocation2 + $0x40] sm:$0xff] %v4921_v40  ;;  %v1979_v41 = vpop.permute.xlu1 %1978  ;;  %3571 = vmatmul.mubr.msk.bf16.gmra.mrb[12].mxu1 %vm190_vm9, %v4921_v40 }
 0x2b3   : > { %v2034_v42 = vld [vmem:[#allocation2 + $0x48] sm:$0xff]  ;;  %v1887_v45 = vpop.permute.xlu0 %1886 }
 0x2b4   : > { %v4929_v44 = vsel %vm4490_vm13, %v1979_v41, %v2034_v42  ;;  %1924 = vst.msk [vmem:[#allocation2 + $0x58] sm:$0xff] %vm588_vm10, %v1887_v45 }
 0x2b5   : > { %2036 = vst [vmem:[#allocation2 + $0x48] sm:$0xff] %v4929_v44  ;;  %v1981_v47 = vpop.permute.xlu1 %1980  ;;  %3574 = vmatprep.mubr.msk.bf16.mxu1 %vm190_vm9, %v4929_v44 }
 0x2b7   : > { %v2037_v29 = vld [vmem:[#allocation2 + $0x50] sm:$0xff]  ;;  %v1889_v36 = vpop.permute.xlu0 %1888 }
 0x2b8   : > { %v4937_v49 = vsel %vm4490_vm13, %v1981_v47, %v2037_v29  ;;  %1925 = vst.msk [vmem:[#allocation2 + $0x60] sm:$0xff] %vm588_vm10, %v1889_v36  ;;  %v3899_v47 = vld [vmem:[%s4164_s11 + $0x30] sm:$0xff] }
 0x2b9   : > { %2039 = vst [vmem:[#allocation2 + $0x50] sm:$0xff] %v4937_v49  ;;  %v1983_v51 = vpop.permute.xlu1 %1982  ;;  %3575 = vmatmul.mubr.msk.bf16.gmra.mrb[16].mxu1 %vm190_vm9, %v4937_v49 }
 0x2bb   : > { %v2040_v52 = vld [vmem:[#allocation2 + $0x58] sm:$0xff]  ;;  %v1891_v53 = vpop.permute.xlu0 %1890 }
 0x2bc   : > { %v4945_v0 = vsel %vm4490_vm13, %v1983_v51, %v2040_v52  ;;  %1926 = vst.msk [vmem:[#allocation2 + $0x68] sm:$0xff] %vm588_vm10, %v1891_v53  ;;  %v3901_v53 = vld [vmem:[%s4164_s11 + $0x38] sm:$0xff] }
 0x2bd   : > { %2042 = vst [vmem:[#allocation2 + $0x58] sm:$0xff] %v4945_v0  ;;  %v1985_v43 = vpop.permute.xlu1 %1984  ;;  %3578 = vmatprep.mubr.msk.bf16.mxu1 %vm190_vm9, %v4945_v0 }
 0x2bf   : > { %v2043_v54 = vld [vmem:[#allocation2 + $0x60] sm:$0xff]  ;;  %v1893_v56 = vpop.permute.xlu0 %1892 }
 0x2c0   : > { %v4953_v12 = vsel %vm4490_vm13, %v1985_v43, %v2043_v54  ;;  %1927 = vst.msk [vmem:[#allocation2 + $0x70] sm:$0xff] %vm588_vm10, %v1893_v56  ;;  %v3902_v43 = vld [vmem:[%s4164_s11 + $0x28] sm:$0xff] }
 0x2c1   : > { %2045 = vst [vmem:[#allocation2 + $0x60] sm:$0xff] %v4953_v12  ;;  %v1987_v57 = vpop.permute.xlu1 %1986  ;;  %3579 = vmatmul.mubr.msk.bf16.gmra.mrb[20].mxu1 %vm190_vm9, %v4953_v12 }
 0x2c3   : > { %v2046_v60 = vld [vmem:[#allocation2 + $0x68] sm:$0xff]  ;;  %v1895_v59 = vpop.permute.xlu0 %1894 }
 0x2c4   : > { %v4961_v11 = vsel %vm4490_vm13, %v1987_v57, %v2046_v60  ;;  %1928 = vst.msk [vmem:[#allocation2 + $0x78] sm:$0xff] %vm588_vm10, %v1895_v59 }
 0x2c5   : > { %2048 = vst [vmem:[#allocation2 + $0x68] sm:$0xff] %v4961_v11  ;;  %3582 = vmatprep.mubr.msk.bf16.mxu1 %vm190_vm9, %v4961_v11  ;;  %v1989_v13 = vpop.permute.xlu1 %1988 }
 0x2c7   : > { %v2049_v38 = vld [vmem:[#allocation2 + $0x70] sm:$0xff]  ;;  %v1897_v55 = vpop.permute.xlu0 %1896 }
 0x2c8   : > { %v2050_v61 = vsel %vm4490_vm13, %v1989_v13, %v2049_v38  ;;  %1929 = vst.msk [vmem:[#allocation2 + $0x80] sm:$0xff] %vm588_vm10, %v1897_v55 }
 0x2c9   : > { %2051 = vst [vmem:[#allocation2 + $0x70] sm:$0xff] %v2050_v61  ;;  %3583 = vmatmul.mubr.msk.bf16.gmra.mrb[24].mxu1 %vm190_vm9, %v2050_v61  ;;  %v1993_v25 = vpop.permute.xlu1 %1992 }
 0x2cb   : > { %v1991_v63 = vpop.permute.xlu0 %1990  ;;  %v2052_v3 = vld [vmem:[#allocation2 + $0x78] sm:$0xff] }
 0x2cc   : > { %v2053_v5 = vsel %vm4490_vm13, %v1991_v63, %v2052_v3  ;;  %v3903_v63 = vld [vmem:[%s4164_s11 + $0x50] sm:$0xff] }
 0x2cd   : > { %2054 = vst [vmem:[#allocation2 + $0x78] sm:$0xff] %v2053_v5  ;;  %3586 = vmatprep.mubr.msk.bf16.mxu1 %vm190_vm9, %v2053_v5 }
 0x2cf   : > { %v2055_v46 = vld [vmem:[#allocation2 + $0x80] sm:$0xff] }
 0x2d0   : > { %v2056_v7 = vsel %vm4490_vm13, %v1993_v25, %v2055_v46  ;;  %v3904_v25 = vld [vmem:[%s4164_s11 + $0x40] sm:$0xff] }
 0x2d1   : > { %2057 = vst [vmem:[#allocation2 + $0x80] sm:$0xff] %v2056_v7  ;;  %3587 = vmatmul.mubr.msk.bf16.gmra.mrb[28].mxu1 %vm190_vm9, %v2056_v7 }
 0x2d2   : > { %3602 = vmatprep.mubr.msk.bf16.mxu1 %vm190_vm9, %v2058_v19 }
 0x2d9   : > { %3603 = vmatmul.mubr.msk.bf16.vlgmr.msra.gmra.mrb[0].mxu1 %vm190_vm9, %v4843_v15  ;;  %v3893_v15 = vld [vmem:[%s5239_s1 + $0x80] sm:$0xff]  }
 0x2da   : > { %3635 = vmatpush3.bf16.msra.mxu1 %v4908_v6  ;;  %3606 = vmatprep.mubr.msk.bf16.mxu1 %vm190_vm9, %v4854_v8  ;;  %v3898_v6 = vld [vmem:[%s4164_s11 + $0x8] sm:$0xff] }
 0x2db   : > { %3636 = vmatprep.subr.bf16.mxu1 %v3890_v10 }
 0x2de   : > { %3637 = vmatpush3.bf16.msra.mxu1 %v3890_v10 }
 0x2df   : > { %3638 = vmatprep.subr.bf16.mxu1 %v3891_v17 }
 0x2e1   : > { %3607 = vmatmul.mubr.msk.bf16.gmra.mrb[4].mxu1 %vm190_vm9, %v4866_v62 }
 0x2e2   : > { %3610 = vmatprep.mubr.msk.bf16.mxu1 %vm190_vm9, %v4877_v20  ;;  %3639 = vmatpush3.bf16.msra.mxu1 %v3891_v17  ;;  %v3906_v17 = vld [vmem:[%s4164_s11 + $0x48] sm:$0xff] }
 0x2e3   : > { %3640 = vmatprep.subr.bf16.mxu1 %v3892_v32 }
 0x2e6   : > { %3641 = vmatpush3.bf16.msra.mxu1 %v3892_v32 }
 0x2e7   : > { %3642 = vmatprep.subr.bf16.mxu1 %v3893_v15 }
 0x2e9   : > { %3611 = vmatmul.mubr.msk.bf16.gmra.mrb[8].mxu1 %vm190_vm9, %v4888_v1 }
 0x2ea   : > { %3614 = vmatprep.mubr.msk.bf16.mxu1 %vm190_vm9, %v4899_v30  ;;  %3643 = vmatpush3.bf16.msra.mxu1 %v3893_v15 }
 0x2eb   : > { %3644 = vmatprep.subr.bf16.mxu1 %v3894_v14 }
 0x2ee   : > { %3645 = vmatpush3.bf16.msra.mxu1 %v3894_v14 }
 0x2f1   : > { %3615 = vmatmul.mubr.msk.bf16.gmra.mrb[12].mxu1 %vm190_vm9, %v4912_v33 }
 0x2f2   : > { %3618 = vmatprep.mubr.msk.bf16.mxu1 %vm190_vm9, %v4921_v40 }
 0x2f9   : > { %3619 = vmatmul.mubr.msk.bf16.gmra.mrb[16].mxu1 %vm190_vm9, %v4929_v44 }
 0x2fa   : > { %3622 = vmatprep.mubr.msk.bf16.mxu1 %vm190_vm9, %v4937_v49 }
 0x301   : > { %3623 = vmatmul.mubr.msk.bf16.gmra.mrb[20].mxu1 %vm190_vm9, %v4945_v0 }
 0x302   : > { %3626 = vmatprep.mubr.msk.bf16.mxu1 %vm190_vm9, %v4953_v12 }
 0x309   : > { %3627 = vmatmul.mubr.msk.bf16.gmra.mrb[24].mxu1 %vm190_vm9, %v4961_v11 }
 0x30a   : > { %3630 = vmatprep.mubr.msk.bf16.mxu1 %vm190_vm9, %v2050_v61 }
 0x311   : > { %3631 = vmatmul.mubr.msk.bf16.gmra.mrb[28].mxu1 %vm190_vm9, %v2053_v5 }
 0x312   : > { %3646 = vmatprep.mubr.msk.bf16.mxu1 %vm190_vm9, %v4854_v8  ;;  %v2619_v8 = vld [vmem:[#allocation2 + $0x88] sm:$0xff] }
 0x319   : > { %3647 = vmatmul.mubr.msk.bf16.vlgmr.msra.gmra.mrb[0].mxu1 %vm190_vm9, %v4866_v62 }
 0x31a   : > { %3650 = vmatprep.mubr.msk.bf16.mxu1 %vm190_vm9, %v4877_v20 }
 0x321   : > { %3651 = vmatmul.mubr.msk.bf16.gmra.mrb[4].mxu1 %vm190_vm9, %v4888_v1 }
 0x322   : > { %3654 = vmatprep.mubr.msk.bf16.mxu1 %vm190_vm9, %v4899_v30  ;;  %v3897_v30 = vld [vmem:[%s4164_s11 + $0x18] sm:$0xff] }
 0x329   : > { %3655 = vmatmul.mubr.msk.bf16.gmra.mrb[8].mxu1 %vm190_vm9, %v4912_v33 }
 0x32a   : > { %3658 = vmatprep.mubr.msk.bf16.mxu1 %vm190_vm9, %v4921_v40 }
 0x331   : > { %3659 = vmatmul.mubr.msk.bf16.gmra.mrb[12].mxu1 %vm190_vm9, %v4929_v44 }
 0x332   : > { %3662 = vmatprep.mubr.msk.bf16.mxu1 %vm190_vm9, %v4937_v49  ;;  %v3900_v49 = vld [vmem:[%s4164_s11 + $0x20] sm:$0xff] }
 0x339   : > { %3663 = vmatmul.mubr.msk.bf16.gmra.mrb[16].mxu1 %vm190_vm9, %v4945_v0 }
 0x33a   : > { %3666 = vmatprep.mubr.msk.bf16.mxu1 %vm190_vm9, %v4953_v12 }
 0x341   : > { %3667 = vmatmul.mubr.msk.bf16.gmra.mrb[20].mxu1 %vm190_vm9, %v4961_v11 }
 0x342   : > { %3670 = vmatprep.mubr.msk.bf16.mxu1 %vm190_vm9, %v2050_v61 }
 0x349   : > { %3671 = vmatmul.mubr.msk.bf16.gmra.mrb[24].mxu1 %vm190_vm9, %v2053_v5 }
 0x34a   : > { %3674 = vmatprep.mubr.msk.bf16.mxu1 %vm190_vm9, %v2056_v7  ;;  %v3905_v7 = vld [vmem:[%s4164_s11 + $0x58] sm:$0xff] }
 0x351   : > { %3675 = vmatmul.mubr.msk.bf16.gmra.mrb[28].mxu1 %vm190_vm9, %v2619_v8 }
 0x3ec   : > { %v3648_v2 = vpop.f32.mrb[0].mxu1 }
 0x3ed   : > { %v2918_v62 = vadd.f32 %v3648_v2, %v5053_v48  ;;  %v2750_v16 = vpop.f32.mrb[1].mxu1 }
 0x3ee   : > { %v2916_v23 = vadd.f32 %v5053_v48, %v2750_v16  ;;  %v3649_v18 = vpop.f32.mrb[2].mxu1 }
 0x3ef   : > { %v2950_v31 = vmul.f32 0.1, %v2918_v62  ;;  %v2919_v20 = vadd.f32 %v3649_v18, %v5053_v48  ;;  %v2753_v24 = vpop.f32.mrb[3].mxu1 }
 0x3f0   : > { %v2948_v22 = vmul.f32 0.1, %v2916_v23  ;;  %v2917_v26 = vadd.f32 %v5053_v48, %v2753_v24  ;;  %v3907_v24 = vld [vmem:[%s4164_s11 + $0x70] sm:$0xff] }
 0x3f1   : > { %v2982_v1 = vadd.f32 %v3895_v4, %v2950_v31  ;;  %v2951_v21 = vmul.f32 0.1, %v2919_v20  ;;  %v3908_v4 = vld [vmem:[%s4164_s11 + $0x60] sm:$0xff] }
 0x3f2   : > { %v2980_v27 = vadd.f32 %v3896_v9, %v2948_v22  ;;  %v2949_v28 = vmul.f32 0.1, %v2917_v26  ;;  %v3909_v9 = vld [vmem:[%s4164_s11 + $0x78] sm:$0xff] }
 0x3f3   : > { %3015 = vst.msk [vmem:[%s5063_s26 + $0x10] sm:$0xff] %vm473_vm6, %v2982_v1  ;;  %v2983_v50 = vadd.f32 %v3897_v30, %v2951_v21 }
 0x3f4   : > { %3013 = vst.msk [vmem:[%s5063_s26] sm:$0xff] %vm473_vm6, %v2980_v27  ;;  %v2981_v37 = vadd.f32 %v3898_v6, %v2949_v28  ;;  %v3652_v58 = vpop.f32.mrb[4].mxu1  ;;  %v3910_v28 = vld [vmem:[%s4164_s11 + $0x68] sm:$0xff] }
 0x3f5   : > { %3016 = vst.msk [vmem:[%s5063_s26 + $0x18] sm:$0xff] %vm473_vm6, %v2983_v50  ;;  %v2922_v33 = vadd.f32 %v3652_v58, %v5053_v48  ;;  %v2766_v34 = vpop.f32.mrb[5].mxu1 }
 0x3f6   : > { %3014 = vst.msk [vmem:[%s5063_s26 + $0x8] sm:$0xff] %vm473_vm6, %v2981_v37  ;;  %v2920_v35 = vadd.f32 %v5053_v48, %v2766_v34  ;;  %v3653_v39 = vpop.f32.mrb[6].mxu1 }
 0x3f7   : > { %v2954_v40 = vmul.f32 0.1, %v2922_v33  ;;  %v2923_v41 = vadd.f32 %v3653_v39, %v5053_v48  ;;  %v2769_v42 = vpop.f32.mrb[7].mxu1 }
 0x3f8   : > { %v2952_v45 = vmul.f32 0.1, %v2920_v35  ;;  %v2921_v44 = vadd.f32 %v5053_v48, %v2769_v42  ;;  %v3911_v42 = vld [vmem:[%s4164_s11 + $0x90] sm:$0xff] }
 0x3f9   : > { %v2986_v29 = vadd.f32 %v3899_v47, %v2954_v40  ;;  %v2955_v36 = vmul.f32 0.1, %v2923_v41  ;;  %v3912_v47 = vld [vmem:[%s4164_s11 + $0x80] sm:$0xff] }
 0x3fa   : > { %v2984_v51 = vadd.f32 %v3900_v49, %v2952_v45  ;;  %v2953_v52 = vmul.f32 0.1, %v2921_v44  ;;  %v3913_v49 = vld [vmem:[%s4164_s11 + $0x98] sm:$0xff] }
 0x3fb   : > { %3019 = vst.msk [vmem:[%s5063_s26 + $0x30] sm:$0xff] %vm473_vm6, %v2986_v29  ;;  %v2987_v0 = vadd.f32 %v3901_v53, %v2955_v36 }
 0x3fc   : > { %3017 = vst.msk [vmem:[%s5063_s26 + $0x20] sm:$0xff] %vm473_vm6, %v2984_v51  ;;  %v2985_v54 = vadd.f32 %v3902_v43, %v2953_v52  ;;  %v3656_v56 = vpop.f32.mrb[8].mxu1  ;;  %v3914_v52 = vld [vmem:[%s4164_s11 + $0x88] sm:$0xff] }
 0x3fd   : > { %3020 = vst.msk [vmem:[%s5063_s26 + $0x38] sm:$0xff] %vm473_vm6, %v2987_v0  ;;  %v2926_v12 = vadd.f32 %v3656_v56, %v5053_v48  ;;  %v2782_v57 = vpop.f32.mrb[9].mxu1 }
 0x3fe   : > { %3018 = vst.msk [vmem:[%s5063_s26 + $0x28] sm:$0xff] %vm473_vm6, %v2985_v54  ;;  %v2924_v60 = vadd.f32 %v5053_v48, %v2782_v57  ;;  %v3657_v59 = vpop.f32.mrb[10].mxu1 }
 0x3ff   : > { %v2958_v11 = vmul.f32 0.1, %v2926_v12  ;;  %v2927_v38 = vadd.f32 %v3657_v59, %v5053_v48  ;;  %v2785_v13 = vpop.f32.mrb[11].mxu1 }
 0x400   : > { %v2956_v55 = vmul.f32 0.1, %v2924_v60  ;;  %v2925_v61 = vadd.f32 %v5053_v48, %v2785_v13  ;;  %v3915_v13 = vld [vmem:[%s4164_s11 + $0xb0] sm:$0xff] }
 0x401   : > { %v2990_v3 = vadd.f32 %v3903_v63, %v2958_v11  ;;  %v2959_v5 = vmul.f32 0.1, %v2927_v38  ;;  %v3916_v63 = vld [vmem:[%s4164_s11 + $0xa0] sm:$0xff] }
 0x402   : > { %v2988_v46 = vadd.f32 %v3904_v25, %v2956_v55  ;;  %v2957_v19 = vmul.f32 0.1, %v2925_v61  ;;  %v3917_v25 = vld [vmem:[%s4164_s11 + $0xb8] sm:$0xff] }
 0x403   : > { %3023 = vst.msk [vmem:[%s5063_s26 + $0x50] sm:$0xff] %vm473_vm6, %v2990_v3  ;;  %v2991_v10 = vadd.f32 %v3905_v7, %v2959_v5 }
 0x404   : > { %3021 = vst.msk [vmem:[%s5063_s26 + $0x40] sm:$0xff] %vm473_vm6, %v2988_v46  ;;  %v2989_v32 = vadd.f32 %v3906_v17, %v2957_v19  ;;  %v3660_v15 = vpop.f32.mrb[12].mxu1  ;;  %v3918_v19 = vld [vmem:[%s4164_s11 + $0xa8] sm:$0xff] }
 0x405   : > { %3024 = vst.msk [vmem:[%s5063_s26 + $0x58] sm:$0xff] %vm473_vm6, %v2991_v10  ;;  %v2930_v14 = vadd.f32 %v3660_v15, %v5053_v48  ;;  %v2798_v8 = vpop.f32.mrb[13].mxu1 }
 0x406   : > { %3022 = vst.msk [vmem:[%s5063_s26 + $0x48] sm:$0xff] %vm473_vm6, %v2989_v32  ;;  %v2928_v2 = vadd.f32 %v5053_v48, %v2798_v8  ;;  %v3661_v62 = vpop.f32.mrb[14].mxu1 }
 0x407   : > { %v2962_v16 = vmul.f32 0.1, %v2930_v14  ;;  %v2931_v23 = vadd.f32 %v3661_v62, %v5053_v48  ;;  %v2801_v18 = vpop.f32.mrb[15].mxu1 }
 0x408   : > { %v2960_v31 = vmul.f32 0.1, %v2928_v2  ;;  %v2929_v20 = vadd.f32 %v5053_v48, %v2801_v18  ;;  %v3919_v18 = vld [vmem:[%s4164_s11 + $0xd0] sm:$0xff] }
 0x409   : > { %v2994_v22 = vadd.f32 %v3907_v24, %v2962_v16  ;;  %v2963_v26 = vmul.f32 0.1, %v2931_v23  ;;  %v3920_v24 = vld [vmem:[%s4164_s11 + $0xc0] sm:$0xff] }
 0x40a   : > { %v2992_v1 = vadd.f32 %v3908_v4, %v2960_v31  ;;  %v2961_v21 = vmul.f32 0.1, %v2929_v20  ;;  %v3921_v4 = vld [vmem:[%s4164_s11 + $0xd8] sm:$0xff] }
 0x40b   : > { %3027 = vst.msk [vmem:[%s5063_s26 + $0x70] sm:$0xff] %vm473_vm6, %v2994_v22  ;;  %v2995_v27 = vadd.f32 %v3909_v9, %v2963_v26 }
 0x40c   : > { %3025 = vst.msk [vmem:[%s5063_s26 + $0x60] sm:$0xff] %vm473_vm6, %v2992_v1  ;;  %v2993_v30 = vadd.f32 %v3910_v28, %v2961_v21  ;;  %v3664_v50 = vpop.f32.mrb[16].mxu1  ;;  %v3922_v21 = vld [vmem:[%s4164_s11 + $0xc8] sm:$0xff] }
 0x40d   : > { %3028 = vst.msk [vmem:[%s5063_s26 + $0x78] sm:$0xff] %vm473_vm6, %v2995_v27  ;;  %v2934_v6 = vadd.f32 %v3664_v50, %v5053_v48  ;;  %v2814_v37 = vpop.f32.mrb[17].mxu1 }
 0x40e   : > { %3026 = vst.msk [vmem:[%s5063_s26 + $0x68] sm:$0xff] %vm473_vm6, %v2993_v30  ;;  %v2932_v58 = vadd.f32 %v5053_v48, %v2814_v37  ;;  %v3665_v33 = vpop.f32.mrb[18].mxu1 }
 0x40f   : > { %v2966_v34 = vmul.f32 0.1, %v2934_v6  ;;  %v2935_v35 = vadd.f32 %v3665_v33, %v5053_v48  ;;  %v2817_v39 = vpop.f32.mrb[19].mxu1 }
 0x410   : > { %v2964_v40 = vmul.f32 0.1, %v2932_v58  ;;  %v2933_v41 = vadd.f32 %v5053_v48, %v2817_v39  ;;  %v3923_v39 = vld [vmem:[%s4164_s11 + $0xf0] sm:$0xff] }
 0x411   : > { %v2998_v45 = vadd.f32 %v3911_v42, %v2966_v34  ;;  %v2967_v44 = vmul.f32 0.1, %v2935_v35  ;;  %v3924_v42 = vld [vmem:[%s4164_s11 + $0xe0] sm:$0xff] }
 0x412   : > { %v2996_v29 = vadd.f32 %v3912_v47, %v2964_v40  ;;  %v2965_v36 = vmul.f32 0.1, %v2933_v41  ;;  %v3925_v47 = vld [vmem:[%s4164_s11 + $0xf8] sm:$0xff] }
 0x413   : > { %3031 = vst.msk [vmem:[%s5063_s26 + $0x90] sm:$0xff] %vm473_vm6, %v2998_v45  ;;  %v2999_v51 = vadd.f32 %v3913_v49, %v2967_v44 }
 0x414   : > { %3029 = vst.msk [vmem:[%s5063_s26 + $0x80] sm:$0xff] %vm473_vm6, %v2996_v29  ;;  %v2997_v53 = vadd.f32 %v3914_v52, %v2965_v36  ;;  %v3668_v0 = vpop.f32.mrb[20].mxu1 }
 0x415   : > { %3032 = vst.msk [vmem:[%s5063_s26 + $0x98] sm:$0xff] %vm473_vm6, %v2999_v51  ;;  %v2938_v43 = vadd.f32 %v3668_v0, %v5053_v48  ;;  %v2830_v54 = vpop.f32.mrb[21].mxu1 }
 0x416   : > { %3030 = vst.msk [vmem:[%s5063_s26 + $0x88] sm:$0xff] %vm473_vm6, %v2997_v53  ;;  %v2936_v56 = vadd.f32 %v5053_v48, %v2830_v54  ;;  %v3669_v12 = vpop.f32.mrb[22].mxu1 }
 0x417   : > { %v2970_v57 = vmul.f32 0.1, %v2938_v43  ;;  %v2939_v60 = vadd.f32 %v3669_v12, %v5053_v48  ;;  %v2833_v59 = vpop.f32.mrb[23].mxu1 }
 0x418   : > { %v2968_v11 = vmul.f32 0.1, %v2936_v56  ;;  %v2937_v38 = vadd.f32 %v5053_v48, %v2833_v59 }
 0x419   : > { %v3002_v55 = vadd.f32 %v3915_v13, %v2970_v57  ;;  %v2971_v61 = vmul.f32 0.1, %v2939_v60 }
 0x41a   : > { %v3000_v3 = vadd.f32 %v3916_v63, %v2968_v11  ;;  %v2969_v5 = vmul.f32 0.1, %v2937_v38 }
 0x41b   : > { %3035 = vst.msk [vmem:[%s5063_s26 + $0xb0] sm:$0xff] %vm473_vm6, %v3002_v55  ;;  %v3003_v46 = vadd.f32 %v3917_v25, %v2971_v61 }
 0x41c   : > { %3033 = vst.msk [vmem:[%s5063_s26 + $0xa0] sm:$0xff] %vm473_vm6, %v3000_v3  ;;  %v3001_v7 = vadd.f32 %v3918_v19, %v2969_v5  ;;  %v3672_v10 = vpop.f32.mrb[24].mxu1 }
 0x41d   : > { %3036 = vst.msk [vmem:[%s5063_s26 + $0xb8] sm:$0xff] %vm473_vm6, %v3003_v46  ;;  %v2942_v17 = vadd.f32 %v3672_v10, %v5053_v48  ;;  %v2846_v32 = vpop.f32.mrb[25].mxu1 }
 0x41e   : > { %3034 = vst.msk [vmem:[%s5063_s26 + $0xa8] sm:$0xff] %vm473_vm6, %v3001_v7  ;;  %v2940_v15 = vadd.f32 %v5053_v48, %v2846_v32  ;;  %v3673_v14 = vpop.f32.mrb[26].mxu1 }
 0x41f   : > { %v2974_v8 = vmul.f32 0.1, %v2942_v17  ;;  %v2943_v2 = vadd.f32 %v3673_v14, %v5053_v48  ;;  %v2849_v62 = vpop.f32.mrb[27].mxu1 }
 0x420   : > { %v2972_v16 = vmul.f32 0.1, %v2940_v15  ;;  %v2941_v23 = vadd.f32 %v5053_v48, %v2849_v62 }
 0x421   : > { %v3006_v31 = vadd.f32 %v3919_v18, %v2974_v8  ;;  %v2975_v20 = vmul.f32 0.1, %v2943_v2 }
 0x422   : > { %v3004_v22 = vadd.f32 %v3920_v24, %v2972_v16  ;;  %v2973_v26 = vmul.f32 0.1, %v2941_v23 }
 0x423   : > { %3039 = vst.msk [vmem:[%s5063_s26 + $0xd0] sm:$0xff] %vm473_vm6, %v3006_v31  ;;  %v3007_v1 = vadd.f32 %v3921_v4, %v2975_v20 }
 0x424   : > { %3037 = vst.msk [vmem:[%s5063_s26 + $0xc0] sm:$0xff] %vm473_vm6, %v3004_v22  ;;  %v3005_v9 = vadd.f32 %v3922_v21, %v2973_v26  ;;  %v3676_v27 = vpop.f32.mrb[28].mxu1 }
 0x425   : > { %3040 = vst.msk [vmem:[%s5063_s26 + $0xd8] sm:$0xff] %vm473_vm6, %v3007_v1  ;;  %v2946_v28 = vadd.f32 %v3676_v27, %v5053_v48  ;;  %v2862_v30 = vpop.f32.mrb[29].mxu1 }
 0x426   : > { %3038 = vst.msk [vmem:[%s5063_s26 + $0xc8] sm:$0xff] %vm473_vm6, %v3005_v9  ;;  %v2944_v50 = vadd.f32 %v5053_v48, %v2862_v30  ;;  %v3677_v6 = vpop.f32.mrb[30].mxu1 }
 0x427   : > { %v2978_v37 = vmul.f32 0.1, %v2946_v28  ;;  %v2947_v58 = vadd.f32 %v3677_v6, %v5053_v48  ;;  %v2865_v33 = vpop.f32.mrb[31].mxu1 }
 0x428   : > { %v2976_v34 = vmul.f32 0.1, %v2944_v50  ;;  %v2945_v35 = vadd.f32 %v5053_v48, %v2865_v33  ;;  %v3926_v48 = vld [vmem:[%s4164_s11 + $0xe8] sm:$0xff] }
 0x429   : > { %v3010_v40 = vadd.f32 %v3923_v39, %v2978_v37  ;;  %v2979_v41 = vmul.f32 0.1, %v2947_v58 }
 0x42a   : > { %v3008_v45 = vadd.f32 %v3924_v42, %v2976_v34  ;;  %v2977_v44 = vmul.f32 0.1, %v2945_v35 }
 0x42b   : > { %3043 = vst.msk [vmem:[%s5063_s26 + $0xf0] sm:$0xff] %vm473_vm6, %v3010_v40  ;;  %v3011_v29 = vadd.f32 %v3925_v47, %v2979_v41 }
 0x42c   : > { %3041 = vst.msk [vmem:[%s5063_s26 + $0xe0] sm:$0xff] %vm473_vm6, %v3008_v45  ;;  %v3009_v36 = vadd.f32 %v3926_v48, %v2977_v44 }
 0x42d   : > { %3044 = vst.msk [vmem:[%s5063_s26 + $0xf8] sm:$0xff] %vm473_vm6, %v3011_v29 }
 0x42e   : > { %3042 = vst.msk [vmem:[%s5063_s26 + $0xe8] sm:$0xff] %vm473_vm6, %v3009_v36 }
 0x42f   : > { %3970 = shalt.err (!%p3967_p2)
}
 0x430   : > { %s3971_s11 = scalar_lea.hbm %s5185_s30, 4096  ;;  %s3975_s17 = scalar_lea.hbm %s5241_s3, 8192 }
 0x431   : > { %p3972_p4 = scmp.ne.s32.totalorder %s5185_s30, %s3971_s11  ;;  %p3976_p9 = scmp.lt.u32.totalorder %s5185_s30, %s5241_s3 }
 0x432   : > { %p3977_p1 = scmp.lt.u32.totalorder %s3975_s17, %s3971_s11  ;;  %p3979_p6 = scmp.lt.u32.totalorder %s3971_s11, %s5185_s30 }
 0x433   : > { %p3973_p5 = pnand %p3972_p4, %p5256_p11 }
 0x434   : > { %p3978_p3 = por %p3977_p1, %p3976_p9 }
 0x435   : > { %p3974_p7 = pneg %p3973_p5 }
 0x436   : > { %p3980_p12 = por %p3979_p6, %p3978_p3 }
 0x438   : > { %p3981_p13 = pnand %p3980_p12, %p3974_p7 }
 0x43a   : > { %3984 = shalt.err (!%p3981_p13)
}
 0x43b   : > { %s4032_s22 = smov 128   ;;  %s4033_s26 = smov 8  }
 0x43c   : > { %3808 = dma.vmem_to_hbm [thread:$0]  (%p5256_p11), %s5187_s27, 4096, %s5185_s30, %s3046_s16, %s4032_s22, %s4032_s22, %s4033_s26  }
 0x43d PF: > { %s3074_s9 = sand.u32 1, %s4011_s12   ;;  %p5257_p8 = scmp.ne.s32.totalorder %s5246_s25, 0 }
 0x43e   : > { %p5258_p10 = scmp.ge.s32.totalorder %s4023_s15, 2  ;;  %s3075_s28 = scalar_lea.sflag [#allocation5], %s3074_s9 }
 0x440   : > { %p3815_p0 = pnand %p5258_p10, %p5257_p8 }
 0x442   : > { %4006 = dma.done.wait (!%p3815_p0), %s3075_s28, 4096  }
 0x443   : > { %4008 = vsyncadd (!%p3815_p0), %s3075_s28, 4294963200  ;;  %p16_p2 = scmp.ge.s32.totalorder %s4079_s18, 4   ;;  %s5259_s12 = smov %s4015_s13 }
 0x444   : > { %s5260_s13 = smov %s4019_s14  ;;  %s5261_s14 = smov %s4091_s21 }
 0x445   : > { %s5262_s15 = smov %s4079_s18  ;;  %18 = sbr.rel (!%p16_p2) target bundleno = 5 (0x5), region = 80 }
 0x44c   :  { %3080 = vsyncpa [#allocation4], 1 }
 0x44d   :  { %3082 = vsyncpa [#allocation4 + $0x1], 1 }
 0x44e   :  { %3083 = vsyncpa [#allocation5], 1 }
 0x44f   :  { %3085 = vsyncpa [#allocation5 + $0x1], 1 }

</bundles_post_ra>
